<compile_context>
chip_gen: v7x
topology: tpu7x:2x2x1
jax: 0.10.0
libtpu: 0.0.40
codegen_flags: <defaults>
</compile_context>

<pallas_src>
import functools

import jax
import jax.numpy as jnp
import numpy as np
from jax.experimental import pallas as pl
from jax.experimental.pallas import tpu as pltpu


def encoder_layer_kernel(
    enc_ref, pos_ref, mult_ref, add_ref,
    g1_ref, be1_ref,
    wqk_ref, bqk_ref, wv_ref, bv_ref,
    wo_ref, bo_ref,
    g2_ref, be2_ref,
    w1_ref, b1_ref, w2_ref, b2_ref,
    out_ref,
    *, time_len, seq_len, num_heads, head_dim, eps, compute_dtype,
):
    T, S, H, hd = time_len, seq_len, num_heads, head_dim
    E = H * hd
    TS = T * S
    TH = T * H

    enc = enc_ref[0].astype(jnp.float32)      # (T*S, E)
    pos = pos_ref[0].astype(jnp.float32)      # (T*S, E)
    mult = mult_ref[0]                        # (T*H, S, S)  dist-gate * not-padded
    add = add_ref[0]                          # (T*H, S, S)  -9e15 on padded keys

    def layernorm(x, gamma, beta):
        mu = jnp.mean(x, axis=-1, keepdims=True)
        var = jnp.mean((x - mu) ** 2, axis=-1, keepdims=True)
        return (x - mu) * jax.lax.rsqrt(var + eps) * gamma + beta

    def mm(x, w_ref, b_ref):
        # bf16 (or f32) MXU operands, f32 accumulation, f32 bias add.
        return jnp.dot(x.astype(compute_dtype), w_ref[...],
                       preferred_element_type=jnp.float32) + b_ref[...]

    # ---- norm1 + fused q|k projection + v projection, batched over T*S rows ----
    src2 = layernorm(enc, g1_ref[...], be1_ref[...])
    qk_in = src2 + pos                                   # q = k = src2 + pos
    qk = mm(qk_in, wqk_ref, bqk_ref)                     # (T*S, 2E)
    v = mm(src2, wv_ref, bv_ref)                         # (T*S, E)

    scale = 1.0 / (float(hd) ** 0.5)
    q = qk[:, :E] * scale                                # pre-scale q once
    k = qk[:, E:]

    # ---- split heads: (T*S, E) -> (T*H, S, hd), (t, h) ordered ----
    def split_heads(x):
        x3 = x.reshape(T, S, E)
        xh = jnp.stack([x3[:, :, h * hd:(h + 1) * hd] for h in range(H)], axis=1)
        return xh.reshape(TH, S, hd)

    qh = split_heads(q).astype(compute_dtype)
    kh = split_heads(k).astype(compute_dtype)
    vh = split_heads(v).astype(compute_dtype)

    # ---- one batched attention over the collapsed (time, head) axis ----
    logits = jnp.einsum('bqd,bkd->bqk', qh, kh,
                        preferred_element_type=jnp.float32)          # (T*H, S, S)
    logits = logits * mult + add          # distance gate + key-padding fill
    m = jnp.max(logits, axis=-1, keepdims=True)
    p = jnp.exp(logits - m)
    attn = p / jnp.sum(p, axis=-1, keepdims=True)
    vals = jnp.einsum('bqk,bkd->bqd', attn.astype(compute_dtype), vh,
                      preferred_element_type=jnp.float32)            # (T*H, S, hd)

    # ---- merge heads back to (T*S, E) (head-major channel order) ----
    vals4 = vals.reshape(T, H, S, hd)
    merged = jnp.concatenate([vals4[:, h] for h in range(H)], axis=-1)  # (T, S, E)
    merged = merged.reshape(TS, E)

    # ---- output projection + residual ----
    enc1 = enc + mm(merged, wo_ref, bo_ref)

    # ---- norm2 + FFN (1x1 conv -> relu -> 1x1 conv) + residual ----
    s2 = layernorm(enc1, g2_ref[...], be2_ref[...])
    hid = jnp.maximum(mm(s2, w1_ref, b1_ref), 0.0)
    ffn = mm(hid, w2_ref, b2_ref)

    out_ref[0] = (enc1 + ffn).astype(out_ref.dtype)


def transformer_encoder_layer_dist(enc_nchw, pos_nchw, coord, mask_bool, params,
                                   *, num_heads, move_limit=25.0,
                                   compute_dtype=jnp.bfloat16):
    B, E, T, S = enc_nchw.shape
    H = num_heads
    hd = E // H
    F = params['W1'].shape[1]
    TS, TH = T * S, T * H

    # channels-last, (time, seq) rows flattened so every matmul sees T*S rows.
    enc = jnp.transpose(enc_nchw, (0, 2, 3, 1)).reshape(B, TS, E)
    pos = jnp.transpose(pos_nchw, (0, 2, 3, 1)).reshape(B, TS, E)

    # distance gate (no sqrt: d2 < limit^2) + key-padding mask, folded into one
    # affine pair applied in-kernel as logits * mult + add.
    diff = coord[:, :, :, None, :] - coord[:, :, None, :, :]      # (B,T,S,S,C)
    d2 = jnp.sum(diff * diff, axis=-1)
    dgate = (d2 < float(move_limit) ** 2).astype(jnp.float32)     # (B,T,S,S)
    padk = mask_bool.astype(jnp.float32)[:, :, None, :]           # (B,T,1,S)
    mult = dgate * (1.0 - padk)                                   # (B,T,S,S)
    add = jnp.broadcast_to(-9e15 * padk, (B, T, S, S))
    # expand over heads and collapse (T,H) to match the kernel's batch axis.
    mult = jnp.broadcast_to(mult[:, :, None], (B, T, H, S, S)).reshape(B, TH, S, S)
    add = jnp.broadcast_to(add[:, :, None], (B, T, H, S, S)).reshape(B, TH, S, S)

    # fuse q|k projection weights; cast matmul weights to compute dtype.
    Wqk = jnp.concatenate([params['Wq'], params['Wk']], axis=1).astype(compute_dtype)
    bqk = jnp.concatenate([params['bq'], params['bk']], axis=1)
    Wv = params['Wv'].astype(compute_dtype)
    Wo = params['Wo'].astype(compute_dtype)
    W1 = params['W1'].astype(compute_dtype)
    W2 = params['W2'].astype(compute_dtype)

    kernel = functools.partial(
        encoder_layer_kernel,
        time_len=T, seq_len=S, num_heads=H, head_dim=hd,
        eps=1e-5, compute_dtype=compute_dtype)

    def batched(shape):
        n_rest = len(shape) - 1

        def idx(b):
            return (b,) + (0,) * n_rest
        return pl.BlockSpec(shape, idx)

    def full(shape):
        # Constant-index weight blocks.  (pipeline_mode=pl.Buffered(1) would
        # halve their VMEM at large E/F; irrelevant at these sizes.)
        return pl.BlockSpec(shape, lambda b: (0, 0))

    in_specs = [
        batched((1, TS, E)),        # encoder rows
        batched((1, TS, E)),        # pos rows
        batched((1, TH, S, S)),     # multiplicative mask
        batched((1, TH, S, S)),     # additive mask
        full((1, E)), full((1, E)),                 # norm1 gamma / beta
        full((E, 2 * E)), full((1, 2 * E)),         # fused Wq|Wk, bq|bk
        full((E, E)), full((1, E)),                 # Wv, bv
        full((E, E)), full((1, E)),                 # Wo, bo
        full((1, E)), full((1, E)),                 # norm2 gamma / beta
        full((E, F)), full((1, F)),                 # linear1
        full((F, E)), full((1, E)),                 # linear2
    ]

    out = pl.pallas_call(
        kernel,
        out_shape=jax.ShapeDtypeStruct((B, TS, E), jnp.float32),
        grid=(B,),
        in_specs=in_specs,
        out_specs=batched((1, TS, E)),
        compiler_params=pltpu.CompilerParams(
            dimension_semantics=("parallel",)),
    )(enc, pos, mult, add,
      params['g1'], params['be1'],
      Wqk, bqk, Wv, params['bv'], Wo, params['bo'],
      params['g2'], params['be2'],
      W1, params['b1'], W2, params['b2'])

    # back to NCHW (B, E, T, S)
    return jnp.transpose(out.reshape(B, T, S, E), (0, 3, 1, 2))


def reference(enc_nchw, pos_nchw, coord, mask_bool, params, *, num_heads,
              move_limit=25.0, eps=1e-5):
    """Pure-JAX reference mirroring the PyTorch forward (eval mode)."""
    hi = jax.lax.Precision.HIGHEST
    B, E, T, S = enc_nchw.shape
    H = num_heads
    hd = E // H
    x = jnp.transpose(enc_nchw, (0, 2, 3, 1))
    pos = jnp.transpose(pos_nchw, (0, 2, 3, 1))

    def ln(z, g, b):
        mu = z.mean(-1, keepdims=True)
        var = ((z - mu) ** 2).mean(-1, keepdims=True)
        return (z - mu) / jnp.sqrt(var + eps) * g + b

    src2 = ln(x, params['g1'], params['be1'])
    qk = src2 + pos
    q = jnp.einsum('btse,ef->btsf', qk, params['Wq'], precision=hi) + params['bq']
    k = jnp.einsum('btse,ef->btsf', qk, params['Wk'], precision=hi) + params['bk']
    v = jnp.einsum('btse,ef->btsf', src2, params['Wv'], precision=hi) + params['bv']

    def split(z):  # (B,T,S,E) -> (B,H,T,S,hd)
        return z.reshape(B, T, S, H, hd).transpose(0, 3, 1, 2, 4)

    qh, kh, vh = split(q), split(k), split(v)
    logits = jnp.einsum('bhtqd,bhtkd->bhtqk', qh, kh, precision=hi) / (hd ** 0.5)
    diff = coord[:, :, :, None, :] - coord[:, :, None, :, :]
    dist = jnp.sqrt(jnp.sum(diff ** 2, axis=-1))
    dmask = (dist < move_limit).astype(jnp.float32)
    logits = logits * dmask[:, None]
    logits = jnp.where(mask_bool[:, None, :, None, :], -9e15, logits)
    attn = jax.nn.softmax(logits, axis=-1)
    vals = jnp.einsum('bhtqk,bhtkd->bhtqd', attn, vh, precision=hi)
    vals = vals.transpose(0, 2, 3, 1, 4).reshape(B, T, S, E)
    out = jnp.einsum('btse,ef->btsf', vals, params['Wo'], precision=hi) + params['bo']
    x1 = x + out
    s2 = ln(x1, params['g2'], params['be2'])
    hid = jax.nn.relu(jnp.einsum('btse,ef->btsf', s2, params['W1'], precision=hi)
                      + params['b1'])
    ffn = jnp.einsum('btsf,fe->btse', hid, params['W2'], precision=hi) + params['b2']
    y = x1 + ffn
    return jnp.transpose(y, (0, 3, 1, 2))


def xavier(key, shape):
    fan_in, fan_out = shape
    lim = (6.0 / (fan_in + fan_out)) ** 0.5
    return jax.random.uniform(key, shape, jnp.float32, -lim, lim)


if __name__ == "__main__":
    # d_model=32, nhead=4, dim_feedforward=64, T(time)=2, S(seq)=8, coord dims=2
    B, E, T, S = 2, 32, 2, 8
    H, F, C = 4, 64, 2
    move_limit = 25.0

    root = jax.random.PRNGKey(0)
    ks = jax.random.split(root, 16)

    enc = jax.random.normal(ks[0], (B, E, T, S), jnp.float32)
    pos = 0.1 * jax.random.normal(ks[1], (B, E, T, S), jnp.float32)
    coord = jax.random.uniform(ks[2], (B, T, S, C), jnp.float32, 0.0, 40.0)
    mask = jax.random.bernoulli(ks[3], 0.2, (B, T, S))

    params = {
        'g1': jnp.ones((1, E), jnp.float32),
        'be1': jnp.zeros((1, E), jnp.float32),
        # qkv_proj (Conv2d 3E->3E, k=1, groups=3): per-group (E_in, E_out) mats,
        # biases filled with 0 as in _reset_parameters.
        'Wq': xavier(ks[4], (E, E)), 'bq': jnp.zeros((1, E), jnp.float32),
        'Wk': xavier(ks[5], (E, E)), 'bk': jnp.zeros((1, E), jnp.float32),
        'Wv': xavier(ks[6], (E, E)), 'bv': jnp.zeros((1, E), jnp.float32),
        'Wo': xavier(ks[7], (E, E)), 'bo': jnp.zeros((1, E), jnp.float32),
        'g2': jnp.ones((1, E), jnp.float32),
        'be2': jnp.zeros((1, E), jnp.float32),
        'W1': xavier(ks[8], (E, F)),
        'b1': 0.01 * jax.random.normal(ks[9], (1, F), jnp.float32),
        'W2': xavier(ks[10], (F, E)),
        'b2': 0.01 * jax.random.normal(ks[11], (1, E), jnp.float32),
    }

    ref = jax.block_until_ready(
        reference(enc, pos, coord, mask, params, num_heads=H, move_limit=move_limit))

    # Strict correctness gate: f32 MXU operands (also the right setting for v5e).
    out_f32 = jax.block_until_ready(
        transformer_encoder_layer_dist(enc, pos, coord, mask, params,
                                       num_heads=H, move_limit=move_limit,
                                       compute_dtype=jnp.float32))
    np.testing.assert_allclose(np.asarray(out_f32), np.asarray(ref),
                               rtol=5e-3, atol=5e-3)

    # bf16 MXU operands (recommended on v6e/v7x): looser tolerance covers the
    # expected bf16 rounding noise; LayerNorm/softmax stay f32.
    out_bf16 = jax.block_until_ready(
        transformer_encoder_layer_dist(enc, pos, coord, mask, params,
                                       num_heads=H, move_limit=move_limit,
                                       compute_dtype=jnp.bfloat16))
    np.testing.assert_allclose(np.asarray(out_bf16), np.asarray(ref),
                               rtol=6e-2, atol=6e-2)

    print("KERNEL_OK")
</pallas_src>

<mosaic_0001>
module attributes {stable_mosaic.version = 11 : i64} {
  func.func @encoder_layer_kernel(%arg0: i32, %arg1: memref<1x16x32xf32, #tpu.memory_space<vmem>>, %arg2: memref<1x16x32xf32, #tpu.memory_space<vmem>>, %arg3: memref<1x8x8x8xf32, #tpu.memory_space<vmem>>, %arg4: memref<1x8x8x8xf32, #tpu.memory_space<vmem>>, %arg5: memref<1x32xf32, #tpu.memory_space<vmem>>, %arg6: memref<1x32xf32, #tpu.memory_space<vmem>>, %arg7: memref<32x64xf32, #tpu.memory_space<vmem>>, %arg8: memref<1x64xf32, #tpu.memory_space<vmem>>, %arg9: memref<32x32xf32, #tpu.memory_space<vmem>>, %arg10: memref<1x32xf32, #tpu.memory_space<vmem>>, %arg11: memref<32x32xf32, #tpu.memory_space<vmem>>, %arg12: memref<1x32xf32, #tpu.memory_space<vmem>>, %arg13: memref<1x32xf32, #tpu.memory_space<vmem>>, %arg14: memref<1x32xf32, #tpu.memory_space<vmem>>, %arg15: memref<32x64xf32, #tpu.memory_space<vmem>>, %arg16: memref<1x64xf32, #tpu.memory_space<vmem>>, %arg17: memref<64x32xf32, #tpu.memory_space<vmem>>, %arg18: memref<1x32xf32, #tpu.memory_space<vmem>>, %arg19: memref<1x16x32xf32, #tpu.memory_space<vmem>>) attributes {dimension_semantics = [#tpu.dimension_semantics<parallel>], iteration_bounds = array<i64: 2>, scalar_prefetch = 0 : i64, scratch_operands = 0 : i64, tpu.core_type = #tpu.core_type<tc>, window_params = [{transform_indices = @transform_0, window_bounds = array<i64: 1, 16, 32>}, {transform_indices = @transform_1, window_bounds = array<i64: 1, 16, 32>}, {transform_indices = @transform_2, window_bounds = array<i64: 1, 8, 8, 8>}, {transform_indices = @transform_3, window_bounds = array<i64: 1, 8, 8, 8>}, {pipeline_mode = #tpu.pipeline_mode<synchronous>, transform_indices = @transform_4, window_bounds = array<i64: 1, 32>}, {pipeline_mode = #tpu.pipeline_mode<synchronous>, transform_indices = @transform_5, window_bounds = array<i64: 1, 32>}, {pipeline_mode = #tpu.pipeline_mode<synchronous>, transform_indices = @transform_6, window_bounds = array<i64: 32, 64>}, {pipeline_mode = #tpu.pipeline_mode<synchronous>, transform_indices = @transform_7, window_bounds = array<i64: 1, 64>}, {pipeline_mode = #tpu.pipeline_mode<synchronous>, transform_indices = @transform_8, window_bounds = array<i64: 32, 32>}, {pipeline_mode = #tpu.pipeline_mode<synchronous>, transform_indices = @transform_9, window_bounds = array<i64: 1, 32>}, {pipeline_mode = #tpu.pipeline_mode<synchronous>, transform_indices = @transform_10, window_bounds = array<i64: 32, 32>}, {pipeline_mode = #tpu.pipeline_mode<synchronous>, transform_indices = @transform_11, window_bounds = array<i64: 1, 32>}, {pipeline_mode = #tpu.pipeline_mode<synchronous>, transform_indices = @transform_12, window_bounds = array<i64: 1, 32>}, {pipeline_mode = #tpu.pipeline_mode<synchronous>, transform_indices = @transform_13, window_bounds = array<i64: 1, 32>}, {pipeline_mode = #tpu.pipeline_mode<synchronous>, transform_indices = @transform_14, window_bounds = array<i64: 32, 64>}, {pipeline_mode = #tpu.pipeline_mode<synchronous>, transform_indices = @transform_15, window_bounds = array<i64: 1, 64>}, {pipeline_mode = #tpu.pipeline_mode<synchronous>, transform_indices = @transform_16, window_bounds = array<i64: 64, 32>}, {pipeline_mode = #tpu.pipeline_mode<synchronous>, transform_indices = @transform_17, window_bounds = array<i64: 1, 32>}, {transform_indices = @transform_18, window_bounds = array<i64: 1, 16, 32>}]} {
    %c0 = arith.constant 0 : index
    %c0_0 = arith.constant 0 : index
    %c0_1 = arith.constant 0 : index
    %0 = vector.load %arg1[%c0, %c0_0, %c0_1] : memref<1x16x32xf32, #tpu.memory_space<vmem>>, vector<1x16x32xf32>
    %1 = vector.shape_cast %0 : vector<1x16x32xf32> to vector<16x32xf32>
    %c0_2 = arith.constant 0 : index
    %c0_3 = arith.constant 0 : index
    %c0_4 = arith.constant 0 : index
    %2 = vector.load %arg2[%c0_2, %c0_3, %c0_4] : memref<1x16x32xf32, #tpu.memory_space<vmem>>, vector<1x16x32xf32>
    %3 = vector.shape_cast %2 : vector<1x16x32xf32> to vector<16x32xf32>
    %c0_5 = arith.constant 0 : index
    %c0_6 = arith.constant 0 : index
    %c0_7 = arith.constant 0 : index
    %c0_8 = arith.constant 0 : index
    %4 = vector.load %arg3[%c0_5, %c0_6, %c0_7, %c0_8] : memref<1x8x8x8xf32, #tpu.memory_space<vmem>>, vector<1x8x8x8xf32>
    %5 = vector.shape_cast %4 : vector<1x8x8x8xf32> to vector<8x8x8xf32>
    %c0_9 = arith.constant 0 : index
    %c0_10 = arith.constant 0 : index
    %c0_11 = arith.constant 0 : index
    %c0_12 = arith.constant 0 : index
    %6 = vector.load %arg4[%c0_9, %c0_10, %c0_11, %c0_12] : memref<1x8x8x8xf32, #tpu.memory_space<vmem>>, vector<1x8x8x8xf32>
    %7 = vector.shape_cast %6 : vector<1x8x8x8xf32> to vector<8x8x8xf32>
    %c0_13 = arith.constant 0 : index
    %c0_14 = arith.constant 0 : index
    %8 = vector.load %arg5[%c0_13, %c0_14] : memref<1x32xf32, #tpu.memory_space<vmem>>, vector<1x32xf32>
    %c0_15 = arith.constant 0 : index
    %c0_16 = arith.constant 0 : index
    %9 = vector.load %arg6[%c0_15, %c0_16] : memref<1x32xf32, #tpu.memory_space<vmem>>, vector<1x32xf32>
    %cst = arith.constant dense<0.000000e+00> : vector<16xf32>
    %10 = vector.multi_reduction <add>, %1, %cst [1] : vector<16x32xf32> to vector<16xf32>
    %11 = vector.shape_cast %10 : vector<16xf32> to vector<16x1xf32>
    %cst_17 = arith.constant 3.200000e+01 : f32
    %12 = vector.broadcast %cst_17 : f32 to vector<16x1xf32>
    %13 = arith.divf %11, %12 : vector<16x1xf32>
    %14 = vector.broadcast %13 : vector<16x1xf32> to vector<16x32xf32>
    %15 = arith.subf %1, %14 : vector<16x32xf32>
    %16 = arith.mulf %15, %15 : vector<16x32xf32>
    %cst_18 = arith.constant dense<0.000000e+00> : vector<16xf32>
    %17 = vector.multi_reduction <add>, %16, %cst_18 [1] : vector<16x32xf32> to vector<16xf32>
    %18 = vector.shape_cast %17 : vector<16xf32> to vector<16x1xf32>
    %cst_19 = arith.constant 3.200000e+01 : f32
    %19 = vector.broadcast %cst_19 : f32 to vector<16x1xf32>
    %20 = arith.divf %18, %19 : vector<16x1xf32>
    %21 = vector.broadcast %13 : vector<16x1xf32> to vector<16x32xf32>
    %22 = arith.subf %1, %21 : vector<16x32xf32>
    %cst_20 = arith.constant 9.99999974E-6 : f32
    %23 = vector.broadcast %cst_20 : f32 to vector<16x1xf32>
    %24 = arith.addf %20, %23 : vector<16x1xf32>
    %25 = math.rsqrt %24 : vector<16x1xf32>
    %26 = vector.broadcast %25 : vector<16x1xf32> to vector<16x32xf32>
    %27 = arith.mulf %22, %26 : vector<16x32xf32>
    %28 = vector.broadcast %8 : vector<1x32xf32> to vector<16x32xf32>
    %29 = arith.mulf %27, %28 : vector<16x32xf32>
    %30 = vector.broadcast %9 : vector<1x32xf32> to vector<16x32xf32>
    %31 = arith.addf %29, %30 : vector<16x32xf32>
    %32 = arith.addf %31, %3 : vector<16x32xf32>
    %c0_21 = arith.constant 0 : index
    %c0_22 = arith.constant 0 : index
    %33 = vector.load %arg7[%c0_21, %c0_22] : memref<32x64xf32, #tpu.memory_space<vmem>>, vector<32x64xf32>
    %cst_23 = arith.constant dense<0.000000e+00> : vector<16x64xf32>
    %34 = tpu.matmul %32, %33, %cst_23 {dimension_numbers = #tpu.dot_dimension_numbers<[1], [0], [0], [1], [0, 0, 1, 1], [], []>} : vector<16x32xf32>, vector<32x64xf32>, vector<16x64xf32> -> vector<16x64xf32>
    %c0_24 = arith.constant 0 : index
    %c0_25 = arith.constant 0 : index
    %35 = vector.load %arg8[%c0_24, %c0_25] : memref<1x64xf32, #tpu.memory_space<vmem>>, vector<1x64xf32>
    %36 = vector.broadcast %35 : vector<1x64xf32> to vector<16x64xf32>
    %37 = arith.addf %34, %36 : vector<16x64xf32>
    %c0_26 = arith.constant 0 : index
    %c0_27 = arith.constant 0 : index
    %38 = vector.load %arg9[%c0_26, %c0_27] : memref<32x32xf32, #tpu.memory_space<vmem>>, vector<32x32xf32>
    %cst_28 = arith.constant dense<0.000000e+00> : vector<16x32xf32>
    %39 = tpu.matmul %31, %38, %cst_28 {dimension_numbers = #tpu.dot_dimension_numbers<[1], [0], [0], [1], [0, 0, 1, 1], [], []>} : vector<16x32xf32>, vector<32x32xf32>, vector<16x32xf32> -> vector<16x32xf32>
    %c0_29 = arith.constant 0 : index
    %c0_30 = arith.constant 0 : index
    %40 = vector.load %arg10[%c0_29, %c0_30] : memref<1x32xf32, #tpu.memory_space<vmem>>, vector<1x32xf32>
    %41 = vector.broadcast %40 : vector<1x32xf32> to vector<16x32xf32>
    %42 = arith.addf %39, %41 : vector<16x32xf32>
    %43 = vector.extract_strided_slice %37 {offsets = [0, 0], sizes = [16, 32], strides = [1, 1]} : vector<16x64xf32> to vector<16x32xf32>
    %cst_31 = arith.constant 0.353553385 : f32
    %44 = vector.broadcast %cst_31 : f32 to vector<16x32xf32>
    %45 = arith.mulf %43, %44 : vector<16x32xf32>
    %46 = vector.extract_strided_slice %37 {offsets = [0, 32], sizes = [16, 32], strides = [1, 1]} : vector<16x64xf32> to vector<16x32xf32>
    %47 = vector.shape_cast %45 : vector<16x32xf32> to vector<2x8x32xf32>
    %48 = vector.extract_strided_slice %47 {offsets = [0, 0, 0], sizes = [2, 8, 8], strides = [1, 1, 1]} : vector<2x8x32xf32> to vector<2x8x8xf32>
    %49 = vector.extract_strided_slice %47 {offsets = [0, 0, 8], sizes = [2, 8, 8], strides = [1, 1, 1]} : vector<2x8x32xf32> to vector<2x8x8xf32>
    %50 = vector.extract_strided_slice %47 {offsets = [0, 0, 16], sizes = [2, 8, 8], strides = [1, 1, 1]} : vector<2x8x32xf32> to vector<2x8x8xf32>
    %51 = vector.extract_strided_slice %47 {offsets = [0, 0, 24], sizes = [2, 8, 8], strides = [1, 1, 1]} : vector<2x8x32xf32> to vector<2x8x8xf32>
    %52 = vector.shape_cast %48 : vector<2x8x8xf32> to vector<2x1x8x8xf32>
    %53 = vector.shape_cast %49 : vector<2x8x8xf32> to vector<2x1x8x8xf32>
    %54 = vector.shape_cast %50 : vector<2x8x8xf32> to vector<2x1x8x8xf32>
    %55 = vector.shape_cast %51 : vector<2x8x8xf32> to vector<2x1x8x8xf32>
    %56 = tpu.concatenate %52, %53, %54, %55 in 1 : vector<2x1x8x8xf32>, vector<2x1x8x8xf32>, vector<2x1x8x8xf32>, vector<2x1x8x8xf32> -> vector<2x4x8x8xf32>
    %57 = vector.shape_cast %56 : vector<2x4x8x8xf32> to vector<8x8x8xf32>
    %58 = vector.shape_cast %46 : vector<16x32xf32> to vector<2x8x32xf32>
    %59 = vector.extract_strided_slice %58 {offsets = [0, 0, 0], sizes = [2, 8, 8], strides = [1, 1, 1]} : vector<2x8x32xf32> to vector<2x8x8xf32>
    %60 = vector.extract_strided_slice %58 {offsets = [0, 0, 8], sizes = [2, 8, 8], strides = [1, 1, 1]} : vector<2x8x32xf32> to vector<2x8x8xf32>
    %61 = vector.extract_strided_slice %58 {offsets = [0, 0, 16], sizes = [2, 8, 8], strides = [1, 1, 1]} : vector<2x8x32xf32> to vector<2x8x8xf32>
    %62 = vector.extract_strided_slice %58 {offsets = [0, 0, 24], sizes = [2, 8, 8], strides = [1, 1, 1]} : vector<2x8x32xf32> to vector<2x8x8xf32>
    %63 = vector.shape_cast %59 : vector<2x8x8xf32> to vector<2x1x8x8xf32>
    %64 = vector.shape_cast %60 : vector<2x8x8xf32> to vector<2x1x8x8xf32>
    %65 = vector.shape_cast %61 : vector<2x8x8xf32> to vector<2x1x8x8xf32>
    %66 = vector.shape_cast %62 : vector<2x8x8xf32> to vector<2x1x8x8xf32>
    %67 = tpu.concatenate %63, %64, %65, %66 in 1 : vector<2x1x8x8xf32>, vector<2x1x8x8xf32>, vector<2x1x8x8xf32>, vector<2x1x8x8xf32> -> vector<2x4x8x8xf32>
    %68 = vector.shape_cast %67 : vector<2x4x8x8xf32> to vector<8x8x8xf32>
    %69 = vector.shape_cast %42 : vector<16x32xf32> to vector<2x8x32xf32>
    %70 = vector.extract_strided_slice %69 {offsets = [0, 0, 0], sizes = [2, 8, 8], strides = [1, 1, 1]} : vector<2x8x32xf32> to vector<2x8x8xf32>
    %71 = vector.extract_strided_slice %69 {offsets = [0, 0, 8], sizes = [2, 8, 8], strides = [1, 1, 1]} : vector<2x8x32xf32> to vector<2x8x8xf32>
    %72 = vector.extract_strided_slice %69 {offsets = [0, 0, 16], sizes = [2, 8, 8], strides = [1, 1, 1]} : vector<2x8x32xf32> to vector<2x8x8xf32>
    %73 = vector.extract_strided_slice %69 {offsets = [0, 0, 24], sizes = [2, 8, 8], strides = [1, 1, 1]} : vector<2x8x32xf32> to vector<2x8x8xf32>
    %74 = vector.shape_cast %70 : vector<2x8x8xf32> to vector<2x1x8x8xf32>
    %75 = vector.shape_cast %71 : vector<2x8x8xf32> to vector<2x1x8x8xf32>
    %76 = vector.shape_cast %72 : vector<2x8x8xf32> to vector<2x1x8x8xf32>
    %77 = vector.shape_cast %73 : vector<2x8x8xf32> to vector<2x1x8x8xf32>
    %78 = tpu.concatenate %74, %75, %76, %77 in 1 : vector<2x1x8x8xf32>, vector<2x1x8x8xf32>, vector<2x1x8x8xf32>, vector<2x1x8x8xf32> -> vector<2x4x8x8xf32>
    %79 = vector.shape_cast %78 : vector<2x4x8x8xf32> to vector<8x8x8xf32>
    "tpu.trace_start"() <{level = 10 : i32, message = "bqd,bkd->bqk"}> : () -> ()
    %cst_32 = arith.constant dense<0.000000e+00> : vector<8x8x8xf32>
    %80 = tpu.matmul %57, %68, %cst_32 {dimension_numbers = #tpu.dot_dimension_numbers<[2], [2], [1], [1], [0, 0, 0, 1, 1, 1], [0], [0]>} : vector<8x8x8xf32>, vector<8x8x8xf32>, vector<8x8x8xf32> -> vector<8x8x8xf32>
    "tpu.trace_stop"() : () -> ()
    %81 = arith.mulf %80, %5 : vector<8x8x8xf32>
    %82 = arith.addf %81, %7 : vector<8x8x8xf32>
    %cst_33 = arith.constant dense<0xFF800000> : vector<8x8xf32>
    %83 = vector.multi_reduction <maximumf>, %82, %cst_33 [2] : vector<8x8x8xf32> to vector<8x8xf32>
    %84 = vector.shape_cast %83 : vector<8x8xf32> to vector<8x8x1xf32>
    %85 = vector.broadcast %84 : vector<8x8x1xf32> to vector<8x8x8xf32>
    %86 = arith.subf %82, %85 : vector<8x8x8xf32>
    %87 = math.exp %86 : vector<8x8x8xf32>
    %cst_34 = arith.constant dense<0.000000e+00> : vector<8x8xf32>
    %88 = vector.multi_reduction <add>, %87, %cst_34 [2] : vector<8x8x8xf32> to vector<8x8xf32>
    %89 = vector.shape_cast %88 : vector<8x8xf32> to vector<8x8x1xf32>
    %90 = vector.broadcast %89 : vector<8x8x1xf32> to vector<8x8x8xf32>
    %91 = arith.divf %87, %90 : vector<8x8x8xf32>
    "tpu.trace_start"() <{level = 10 : i32, message = "bqk,bkd->bqd"}> : () -> ()
    %cst_35 = arith.constant dense<0.000000e+00> : vector<8x8x8xf32>
    %92 = tpu.matmul %91, %79, %cst_35 {dimension_numbers = #tpu.dot_dimension_numbers<[2], [1], [1], [2], [0, 0, 0, 1, 1, 2], [0], [0]>} : vector<8x8x8xf32>, vector<8x8x8xf32>, vector<8x8x8xf32> -> vector<8x8x8xf32>
    "tpu.trace_stop"() : () -> ()
    %93 = vector.shape_cast %92 : vector<8x8x8xf32> to vector<2x4x8x8xf32>
    %94 = vector.extract_strided_slice %93 {offsets = [0, 0, 0, 0], sizes = [2, 1, 8, 8], strides = [1, 1, 1, 1]} : vector<2x4x8x8xf32> to vector<2x1x8x8xf32>
    %95 = vector.shape_cast %94 : vector<2x1x8x8xf32> to vector<2x8x8xf32>
    %96 = vector.extract_strided_slice %93 {offsets = [0, 1, 0, 0], sizes = [2, 1, 8, 8], strides = [1, 1, 1, 1]} : vector<2x4x8x8xf32> to vector<2x1x8x8xf32>
    %97 = vector.shape_cast %96 : vector<2x1x8x8xf32> to vector<2x8x8xf32>
    %98 = vector.extract_strided_slice %93 {offsets = [0, 2, 0, 0], sizes = [2, 1, 8, 8], strides = [1, 1, 1, 1]} : vector<2x4x8x8xf32> to vector<2x1x8x8xf32>
    %99 = vector.shape_cast %98 : vector<2x1x8x8xf32> to vector<2x8x8xf32>
    %100 = vector.extract_strided_slice %93 {offsets = [0, 3, 0, 0], sizes = [2, 1, 8, 8], strides = [1, 1, 1, 1]} : vector<2x4x8x8xf32> to vector<2x1x8x8xf32>
    %101 = vector.shape_cast %100 : vector<2x1x8x8xf32> to vector<2x8x8xf32>
    %102 = tpu.concatenate %95, %97, %99, %101 in 2 : vector<2x8x8xf32>, vector<2x8x8xf32>, vector<2x8x8xf32>, vector<2x8x8xf32> -> vector<2x8x32xf32>
    %103 = vector.shape_cast %102 : vector<2x8x32xf32> to vector<16x32xf32>
    %c0_36 = arith.constant 0 : index
    %c0_37 = arith.constant 0 : index
    %104 = vector.load %arg11[%c0_36, %c0_37] : memref<32x32xf32, #tpu.memory_space<vmem>>, vector<32x32xf32>
    %cst_38 = arith.constant dense<0.000000e+00> : vector<16x32xf32>
    %105 = tpu.matmul %103, %104, %cst_38 {dimension_numbers = #tpu.dot_dimension_numbers<[1], [0], [0], [1], [0, 0, 1, 1], [], []>} : vector<16x32xf32>, vector<32x32xf32>, vector<16x32xf32> -> vector<16x32xf32>
    %c0_39 = arith.constant 0 : index
    %c0_40 = arith.constant 0 : index
    %106 = vector.load %arg12[%c0_39, %c0_40] : memref<1x32xf32, #tpu.memory_space<vmem>>, vector<1x32xf32>
    %107 = vector.broadcast %106 : vector<1x32xf32> to vector<16x32xf32>
    %108 = arith.addf %105, %107 : vector<16x32xf32>
    %109 = arith.addf %1, %108 : vector<16x32xf32>
    %c0_41 = arith.constant 0 : index
    %c0_42 = arith.constant 0 : index
    %110 = vector.load %arg13[%c0_41, %c0_42] : memref<1x32xf32, #tpu.memory_space<vmem>>, vector<1x32xf32>
    %c0_43 = arith.constant 0 : index
    %c0_44 = arith.constant 0 : index
    %111 = vector.load %arg14[%c0_43, %c0_44] : memref<1x32xf32, #tpu.memory_space<vmem>>, vector<1x32xf32>
    %cst_45 = arith.constant dense<0.000000e+00> : vector<16xf32>
    %112 = vector.multi_reduction <add>, %109, %cst_45 [1] : vector<16x32xf32> to vector<16xf32>
    %113 = vector.shape_cast %112 : vector<16xf32> to vector<16x1xf32>
    %cst_46 = arith.constant 3.200000e+01 : f32
    %114 = vector.broadcast %cst_46 : f32 to vector<16x1xf32>
    %115 = arith.divf %113, %114 : vector<16x1xf32>
    %116 = vector.broadcast %115 : vector<16x1xf32> to vector<16x32xf32>
    %117 = arith.subf %109, %116 : vector<16x32xf32>
    %118 = arith.mulf %117, %117 : vector<16x32xf32>
    %cst_47 = arith.constant dense<0.000000e+00> : vector<16xf32>
    %119 = vector.multi_reduction <add>, %118, %cst_47 [1] : vector<16x32xf32> to vector<16xf32>
    %120 = vector.shape_cast %119 : vector<16xf32> to vector<16x1xf32>
    %cst_48 = arith.constant 3.200000e+01 : f32
    %121 = vector.broadcast %cst_48 : f32 to vector<16x1xf32>
    %122 = arith.divf %120, %121 : vector<16x1xf32>
    %123 = vector.broadcast %115 : vector<16x1xf32> to vector<16x32xf32>
    %124 = arith.subf %109, %123 : vector<16x32xf32>
    %cst_49 = arith.constant 9.99999974E-6 : f32
    %125 = vector.broadcast %cst_49 : f32 to vector<16x1xf32>
    %126 = arith.addf %122, %125 : vector<16x1xf32>
    %127 = math.rsqrt %126 : vector<16x1xf32>
    %128 = vector.broadcast %127 : vector<16x1xf32> to vector<16x32xf32>
    %129 = arith.mulf %124, %128 : vector<16x32xf32>
    %130 = vector.broadcast %110 : vector<1x32xf32> to vector<16x32xf32>
    %131 = arith.mulf %129, %130 : vector<16x32xf32>
    %132 = vector.broadcast %111 : vector<1x32xf32> to vector<16x32xf32>
    %133 = arith.addf %131, %132 : vector<16x32xf32>
    %c0_50 = arith.constant 0 : index
    %c0_51 = arith.constant 0 : index
    %134 = vector.load %arg15[%c0_50, %c0_51] : memref<32x64xf32, #tpu.memory_space<vmem>>, vector<32x64xf32>
    %cst_52 = arith.constant dense<0.000000e+00> : vector<16x64xf32>
    %135 = tpu.matmul %133, %134, %cst_52 {dimension_numbers = #tpu.dot_dimension_numbers<[1], [0], [0], [1], [0, 0, 1, 1], [], []>} : vector<16x32xf32>, vector<32x64xf32>, vector<16x64xf32> -> vector<16x64xf32>
    %c0_53 = arith.constant 0 : index
    %c0_54 = arith.constant 0 : index
    %136 = vector.load %arg16[%c0_53, %c0_54] : memref<1x64xf32, #tpu.memory_space<vmem>>, vector<1x64xf32>
    %137 = vector.broadcast %136 : vector<1x64xf32> to vector<16x64xf32>
    %138 = arith.addf %135, %137 : vector<16x64xf32>
    %cst_55 = arith.constant 0.000000e+00 : f32
    %139 = vector.broadcast %cst_55 : f32 to vector<16x64xf32>
    %140 = arith.maximumf %138, %139 : vector<16x64xf32>
    %c0_56 = arith.constant 0 : index
    %c0_57 = arith.constant 0 : index
    %141 = vector.load %arg17[%c0_56, %c0_57] : memref<64x32xf32, #tpu.memory_space<vmem>>, vector<64x32xf32>
    %cst_58 = arith.constant dense<0.000000e+00> : vector<16x32xf32>
    %142 = tpu.matmul %140, %141, %cst_58 {dimension_numbers = #tpu.dot_dimension_numbers<[1], [0], [0], [1], [0, 0, 1, 1], [], []>} : vector<16x64xf32>, vector<64x32xf32>, vector<16x32xf32> -> vector<16x32xf32>
    %c0_59 = arith.constant 0 : index
    %c0_60 = arith.constant 0 : index
    %143 = vector.load %arg18[%c0_59, %c0_60] : memref<1x32xf32, #tpu.memory_space<vmem>>, vector<1x32xf32>
    %144 = vector.broadcast %143 : vector<1x32xf32> to vector<16x32xf32>
    %145 = arith.addf %142, %144 : vector<16x32xf32>
    %146 = arith.addf %109, %145 : vector<16x32xf32>
    %c0_61 = arith.constant 0 : index
    %c0_62 = arith.constant 0 : index
    %c0_63 = arith.constant 0 : index
    %147 = vector.load %arg19[%c0_61, %c0_62, %c0_63] : memref<1x16x32xf32, #tpu.memory_space<vmem>>, vector<1x16x32xf32>
    %148 = vector.shape_cast %147 : vector<1x16x32xf32> to vector<16x32xf32>
    %149 = vector.shape_cast %146 : vector<16x32xf32> to vector<1x16x32xf32>
    tpu.vector_store %arg19[%c0_61, %c0_62, %c0_63], %149 {strides = array<i32>} : memref<1x16x32xf32, #tpu.memory_space<vmem>>, vector<1x16x32xf32>,
    return
  }
  func.func @transform_0(%arg0: i32) -> (i32, i32, i32) {
    %c0_i32 = arith.constant 0 : i32
    %c0_i32_0 = arith.constant 0 : i32
    %c0_i32_1 = arith.constant 0 : i32
    return %arg0, %c0_i32, %c0_i32_0 : i32, i32, i32
  }
  func.func @transform_1(%arg0: i32) -> (i32, i32, i32) {
    %c0_i32 = arith.constant 0 : i32
    %c0_i32_0 = arith.constant 0 : i32
    %c0_i32_1 = arith.constant 0 : i32
    return %arg0, %c0_i32, %c0_i32_0 : i32, i32, i32
  }
  func.func @transform_2(%arg0: i32) -> (i32, i32, i32, i32) {
    %c0_i32 = arith.constant 0 : i32
    %c0_i32_0 = arith.constant 0 : i32
    %c0_i32_1 = arith.constant 0 : i32
    %c0_i32_2 = arith.constant 0 : i32
    return %arg0, %c0_i32, %c0_i32_0, %c0_i32_1 : i32, i32, i32, i32
  }
  func.func @transform_3(%arg0: i32) -> (i32, i32, i32, i32) {
    %c0_i32 = arith.constant 0 : i32
    %c0_i32_0 = arith.constant 0 : i32
    %c0_i32_1 = arith.constant 0 : i32
    %c0_i32_2 = arith.constant 0 : i32
    return %arg0, %c0_i32, %c0_i32_0, %c0_i32_1 : i32, i32, i32, i32
  }
  func.func @transform_4(%arg0: i32) -> (i32, i32) {
    %c0_i32 = arith.constant 0 : i32
    %c0_i32_0 = arith.constant 0 : i32
    %c0_i32_1 = arith.constant 0 : i32
    return %c0_i32, %c0_i32_0 : i32, i32
  }
  func.func @transform_5(%arg0: i32) -> (i32, i32) {
    %c0_i32 = arith.constant 0 : i32
    %c0_i32_0 = arith.constant 0 : i32
    %c0_i32_1 = arith.constant 0 : i32
    return %c0_i32, %c0_i32_0 : i32, i32
  }
  func.func @transform_6(%arg0: i32) -> (i32, i32) {
    %c0_i32 = arith.constant 0 : i32
    %c0_i32_0 = arith.constant 0 : i32
    %c0_i32_1 = arith.constant 0 : i32
    return %c0_i32, %c0_i32_0 : i32, i32
  }
  func.func @transform_7(%arg0: i32) -> (i32, i32) {
    %c0_i32 = arith.constant 0 : i32
    %c0_i32_0 = arith.constant 0 : i32
    %c0_i32_1 = arith.constant 0 : i32
    return %c0_i32, %c0_i32_0 : i32, i32
  }
  func.func @transform_8(%arg0: i32) -> (i32, i32) {
    %c0_i32 = arith.constant 0 : i32
    %c0_i32_0 = arith.constant 0 : i32
    %c0_i32_1 = arith.constant 0 : i32
    return %c0_i32, %c0_i32_0 : i32, i32
  }
  func.func @transform_9(%arg0: i32) -> (i32, i32) {
    %c0_i32 = arith.constant 0 : i32
    %c0_i32_0 = arith.constant 0 : i32
    %c0_i32_1 = arith.constant 0 : i32
    return %c0_i32, %c0_i32_0 : i32, i32
  }
  func.func @transform_10(%arg0: i32) -> (i32, i32) {
    %c0_i32 = arith.constant 0 : i32
    %c0_i32_0 = arith.constant 0 : i32
    %c0_i32_1 = arith.constant 0 : i32
    return %c0_i32, %c0_i32_0 : i32, i32
  }
  func.func @transform_11(%arg0: i32) -> (i32, i32) {
    %c0_i32 = arith.constant 0 : i32
    %c0_i32_0 = arith.constant 0 : i32
    %c0_i32_1 = arith.constant 0 : i32
    return %c0_i32, %c0_i32_0 : i32, i32
  }
  func.func @transform_12(%arg0: i32) -> (i32, i32) {
    %c0_i32 = arith.constant 0 : i32
    %c0_i32_0 = arith.constant 0 : i32
    %c0_i32_1 = arith.constant 0 : i32
    return %c0_i32, %c0_i32_0 : i32, i32
  }
  func.func @transform_13(%arg0: i32) -> (i32, i32) {
    %c0_i32 = arith.constant 0 : i32
    %c0_i32_0 = arith.constant 0 : i32
    %c0_i32_1 = arith.constant 0 : i32
    return %c0_i32, %c0_i32_0 : i32, i32
  }
  func.func @transform_14(%arg0: i32) -> (i32, i32) {
    %c0_i32 = arith.constant 0 : i32
    %c0_i32_0 = arith.constant 0 : i32
    %c0_i32_1 = arith.constant 0 : i32
    return %c0_i32, %c0_i32_0 : i32, i32
  }
  func.func @transform_15(%arg0: i32) -> (i32, i32) {
    %c0_i32 = arith.constant 0 : i32
    %c0_i32_0 = arith.constant 0 : i32
    %c0_i32_1 = arith.constant 0 : i32
    return %c0_i32, %c0_i32_0 : i32, i32
  }
  func.func @transform_16(%arg0: i32) -> (i32, i32) {
    %c0_i32 = arith.constant 0 : i32
    %c0_i32_0 = arith.constant 0 : i32
    %c0_i32_1 = arith.constant 0 : i32
    return %c0_i32, %c0_i32_0 : i32, i32
  }
  func.func @transform_17(%arg0: i32) -> (i32, i32) {
    %c0_i32 = arith.constant 0 : i32
    %c0_i32_0 = arith.constant 0 : i32
    %c0_i32_1 = arith.constant 0 : i32
    return %c0_i32, %c0_i32_0 : i32, i32
  }
  func.func @transform_18(%arg0: i32) -> (i32, i32, i32) {
    %c0_i32 = arith.constant 0 : i32
    %c0_i32_0 = arith.constant 0 : i32
    %c0_i32_1 = arith.constant 0 : i32
    return %arg0, %c0_i32, %c0_i32_0 : i32, i32, i32
  }
}

</mosaic_0001>

<bundles_post_ra>
// kernel: tpu_custom_call.1
= control target key start
LH: loop header
LB: loop body
LE: loop exit
PB: predicated region body
PF: predicated region fallthrough
CT: control target
= control target key end

     0   :  { %s4243_s0 = inlined_call_operand.vmem [shape: f32[2,16,32], index: 0, kind: input, shape index: {}]   ;;  %s4244_s1 = inlined_call_operand.vmem [shape: f32[2,16,32], index: 1, kind: input, shape index: {}]   ;;  %s4245_s2 = inlined_call_operand.hbm [shape: f32[2,8,8,8], index: 2, kind: input, shape index: {}]   ;;  %s4246_s3 = inlined_call_operand.hbm [shape: f32[2,8,8,8], index: 3, kind: input, shape index: {}]   ;;  %s4247_s4 = inlined_call_operand.vmem [shape: f32[1,32], index: 4, kind: input, shape index: {}]   ;;  %s4248_s5 = inlined_call_operand.vmem [shape: f32[1,32], index: 5, kind: input, shape index: {}]   ;;  %s4249_s6 = inlined_call_operand.vmem [shape: f32[32,64], index: 6, kind: input, shape index: {}]   ;;  %s4250_s7 = inlined_call_operand.vmem [shape: f32[1,64], index: 7, kind: input, shape index: {}]   ;;  %s4251_s8 = inlined_call_operand.hbm [shape: f32[32,32], index: 8, kind: input, shape index: {}]   ;;  %s4252_s9 = inlined_call_operand.vmem [shape: f32[1,32], index: 9, kind: input, shape index: {}]   ;;  %s4253_s10 = inlined_call_operand.hbm [shape: f32[32,32], index: 10, kind: input, shape index: {}]   ;;  %s4254_s11 = inlined_call_operand.vmem [shape: f32[1,32], index: 11, kind: input, shape index: {}]   ;;  %s4255_s12 = inlined_call_operand.vmem [shape: f32[1,32], index: 12, kind: input, shape index: {}]   ;;  %s4256_s13 = inlined_call_operand.vmem [shape: f32[1,32], index: 13, kind: input, shape index: {}]   ;;  %s4257_s14 = inlined_call_operand.hbm [shape: f32[32,64], index: 14, kind: input, shape index: {}]   ;;  %s4258_s15 = inlined_call_operand.vmem [shape: f32[1,64], index: 15, kind: input, shape index: {}]   ;;  %s4259_s16 = inlined_call_operand.vmem [shape: f32[64,32], index: 16, kind: input, shape index: {}]   ;;  %s4260_s17 = inlined_call_operand.vmem [shape: f32[1,32], index: 17, kind: input, shape index: {}]   ;;  %s4261_s18 = inlined_call_operand.hbm [shape: f32[2,16,32], index: 18, kind: output, shape index: {}]  }
   0x1   :  { %4276 = sst [smem:[#allocation21_spill]] %s4243_s0 }
   0x2   :  { %4277 = sst [smem:[#allocation22_spill]] %s4244_s1 }
   0x3   :  { %4278 = sst [smem:[#allocation23_spill]] %s4245_s2 }
   0x4   :  { %4279 = sst [smem:[#allocation24_spill]] %s4251_s8 }
   0x5   :  { %4280 = sst [smem:[#allocation25_spill]] %s4253_s10 }
   0x6   :  { %4281 = sst [smem:[#allocation26_spill]] %s4254_s11 }
   0x7   :  { %4282 = sst [smem:[#allocation27_spill]] %s4255_s12 }
   0x8   :  { %4283 = sst [smem:[#allocation28_spill]] %s4256_s13 }
   0x9   :  { %4284 = sst [smem:[#allocation29_spill]] %s4257_s14 }
   0xa   :  { %4285 = sst [smem:[#allocation30_spill]] %s4258_s15 }
   0xb   :  { %4286 = sst [smem:[#allocation31_spill]] %s4259_s16 }
   0xc   :  { %4287 = sst [smem:[#allocation32_spill]] %s4260_s17 }
   0xd   :  { %4288 = sst [smem:[#allocation33_spill]] %s4261_s18 }
   0xe   :  { %23 = vsyncpa [#allocation3], 0 }
   0xf   :  { %25 = vsyncpa [#allocation3 + $0x1], 0 }
  0x10   :  { %26 = vsyncpa [#allocation6], 0 }
  0x11   :  { %28 = vsyncpa [#allocation6 + $0x1], 0 }
  0x12   :  { %29 = vsyncpa [#allocation9], 0 }
  0x13   :  { %30 = vsyncpa [#allocation4], 0 }
  0x14   :  { %32 = vsyncpa [#allocation4 + $0x1], 0  ;;  %s3647_s27 = smov 0   ;;  %s3649_s28 = smov 0  }
  0x15   :  { %s3651_s29 = smov 0   ;;  %s3653_s30 = smov 0  }
  0x16 LB: > { %4289 = sst [smem:[#allocation17_spill]] %s3520_s27  ;;  %s3668_s0 = sadd.s32 4294967295, %s3532_s30   ;;  %s3532_s30 = sphi %s3653_s30, %s4331_s30   ;;  %s3528_s29 = sphi %s3651_s29, %s4328_s29   ;;  %s3524_s28 = sphi %s3649_s28, %s4330_s28   ;;  %s3520_s27 = sphi %s3647_s27, %s4329_s27  }
  0x17   : > { %4290 = sst [smem:[#allocation18_spill]] %s3528_s29  ;;  %s2843_s19 = sadd.s32 4294967294, %s3532_s30  }
  0x18   : > { %p110_p0 = scmp.ne.s32.totalorder %s3524_s28, %s3520_s27  ;;  %p4266_p1 = scmp.eq.s32.totalorder %s3668_s0, 0 }
  0x19   : > { %p460_p3 = scmp.eq.s32.totalorder %s2843_s19, 1  ;;  %p2844_p5 = scmp.ge.s32.totalorder %s3532_s30, 1 }
  0x1a   : > { %p3677_p4 = por %p4266_p1, %p110_p0  ;;  %p467_p7 = scmp.lt.s32.totalorder %s3532_s30, 3 }
  0x1b   : > { %p3682_p6 = por %p460_p3, %p110_p0  ;;  %s3534_s22 = smov [#allocation7]  }
  0x1c   : > { %s4291_s1 = scalar_select %p3677_p4, 1, 0 }
  0x1d   : > { %s4292_s20 = scalar_select %p3682_p6, 1, 0 }
  0x1e   : > { %p3687_p8 = pnand %p2844_p5, %p467_p7  ;;  %s491_s2 = sshll.u32 %s3534_s22, 4  ;;  %s3691_s2 = int_to_ptr.vmem [resolvable:$true] %s491_s2 }
  0x1f   : > { %4293 = sst [smem:[#allocation19_spill]] %s4292_s20  ;;  %s3535_s24 = smov [#allocation8]  }
  0x20   : > { %s4294_s21 = scalar_select %p3687_p8, 1, 0 }
  0x21   : > { %p3194_p9 = pneg %p3687_p8  ;;  %s507_s25 = sshll.u32 %s3535_s24, 4  ;;  %s3702_s25 = int_to_ptr.vmem [resolvable:$true] %s507_s25 }
  0x22   : > { %s3536_s26 = smov [#allocation10]   ;;  %s4296_s8 = sld [smem:[#allocation24_spill]] }
  0x23   : > { %p3698_p11 = pnand %p3194_p9, %p4266_p1  ;;  %s3704_s19 = sshll.u32 %s3536_s26, 4  ;;  %s530_s19 = int_to_ptr.vmem [resolvable:$true] %s3704_s19 }
  0x25   : > { %p3714_p13 = pneg %p3698_p11 }
  0x28   : > { %s3310_s27 = scalar_lea.hbm %s4296_s8, 512 }
  0x29   : > { %p3311_p12 = scmp.ne.s32.totalorder %s4296_s8, %s3310_s27  ;;  %p3317_p5 = scmp.lt.u32.totalorder %s3310_s27, %s4296_s8 }
  0x2b   : > { %p3313_p0 = pnand %p3714_p13, %p3311_p12 }
  0x2d   : > { %p3314_p3 = pneg %p3313_p0 }
  0x2f   : > { %p3319_p7 = pnand %p3317_p5, %p3314_p3 }
  0x31   : > { %3322 = shalt.err (!%p3319_p7)
}
  0x32   : > { %s3323_s17 = scalar_lea.vmem %s3691_s2, 512  ;;  %p3331_p2 = scmp.lt.s32.totalorder %s3691_s2, %s3691_s2 }
  0x33   : > { %p3324_p9 = scmp.ne.s32.totalorder %s3691_s2, %s3323_s17  ;;  %p3332_p6 = scmp.lt.s32.totalorder %s3323_s17, %s3323_s17 }
  0x35   : > { %p3326_p10 = pnand %p3324_p9, %p3714_p13  ;;  %p3333_p12 = por %p3332_p6, %p3331_p2 }
  0x37   : > { %p3327_p1 = pneg %p3326_p10 }
  0x39   : > { %p3334_p0 = pnand %p3333_p12, %p3327_p1 }
  0x3b   : > { %3337 = shalt.err (!%p3334_p0)
}
  0x3c   : > { %s4270_s18 = smov 128   ;;  %s4272_s27 = smov 8  }
  0x3d   : > { %3197 = dma.hbm_to_vmem [thread:$0]  (!%p3698_p11), %s4296_s8, 512, %s3691_s2, [#allocation6], %s4270_s18, %s4270_s18, %s4272_s27  }
  0x3e   : > { %s4298_s10 = sld [smem:[#allocation25_spill]] }
  0x44   : > { %s3338_s17 = scalar_lea.hbm %s4298_s10, 512 }
  0x45   : > { %p3339_p1 = scmp.ne.s32.totalorder %s4298_s10, %s3338_s17  ;;  %p3345_p10 = scmp.lt.u32.totalorder %s3338_s17, %s4298_s10 }
  0x47   : > { %p3341_p2 = pnand %p3339_p1, %p3714_p13 }
  0x49   : > { %p3342_p6 = pneg %p3341_p2 }
  0x4b   : > { %p3347_p3 = pnand %p3345_p10, %p3342_p6 }
  0x4d   : > { %3350 = shalt.err (!%p3347_p3)
}
  0x4e   : > { %s3351_s2 = scalar_lea.vmem %s3702_s25, 512  ;;  %p3359_p12 = scmp.lt.s32.totalorder %s3702_s25, %s3702_s25 }
  0x4f   : > { %p3352_p5 = scmp.ne.s32.totalorder %s3702_s25, %s3351_s2  ;;  %p3360_p0 = scmp.lt.s32.totalorder %s3351_s2, %s3351_s2 }
  0x51   : > { %p3354_p7 = pnand %p3352_p5, %p3714_p13  ;;  %p3361_p1 = por %p3360_p0, %p3359_p12 }
  0x53   : > { %p3355_p9 = pneg %p3354_p7 }
  0x55   : > { %p3362_p2 = pnand %p3361_p1, %p3355_p9 }
  0x57   : > { %3365 = shalt.err (!%p3362_p2)
}
  0x58   : > { %3200 = dma.hbm_to_vmem [thread:$0]  (!%p3698_p11), %s4298_s10, 512, %s3702_s25, [#allocation9], %s4270_s18, %s4270_s18, %s4272_s27  }
  0x59   : > { %s4299_s14 = sld [smem:[#allocation29_spill]] }
  0x5f   : > { %s3366_s20 = scalar_lea.hbm %s4299_s14, 512 }
  0x60   : > { %p3367_p6 = scmp.ne.s32.totalorder %s4299_s14, %s3366_s20  ;;  %p3373_p5 = scmp.lt.u32.totalorder %s3366_s20, %s4299_s14 }
  0x62   : > { %p3369_p10 = pnand %p3367_p6, %p3714_p13 }
  0x64   : > { %p3370_p3 = pneg %p3369_p10 }
  0x66   : > { %p3375_p7 = pnand %p3373_p5, %p3370_p3 }
  0x68   : > { %3378 = shalt.err (!%p3375_p7)
}
  0x69   : > { %s3379_s2 = scalar_lea.vmem %s530_s19, 512  ;;  %p3387_p1 = scmp.lt.s32.totalorder %s530_s19, %s530_s19 }
  0x6a   : > { %p3380_p9 = scmp.ne.s32.totalorder %s530_s19, %s3379_s2  ;;  %p3388_p2 = scmp.lt.s32.totalorder %s3379_s2, %s3379_s2 }
  0x6c   : > { %p3382_p12 = pnand %p3380_p9, %p3714_p13  ;;  %p3389_p4 = por %p3388_p2, %p3387_p1 }
  0x6e   : > { %p3383_p0 = pneg %p3382_p12 }
  0x70   : > { %p3390_p8 = pnand %p3389_p4, %p3383_p0 }
  0x72   : > { %3393 = shalt.err (!%p3390_p8)
}
  0x73   : > { %3203 = dma.hbm_to_vmem [thread:$0]  (!%p3698_p11), %s4299_s14, 512, %s530_s19, [#allocation9], %s4270_s18, %s4270_s18, %s4272_s27  }
  0x74   : > { %s3787_s15 = sadd.s32 1, %s3532_s30   ;;  %s97_s12 = sadd.s32 1, %s3528_s29 }
  0x75   : > { %s94_s23 = ssub.s32 %s3532_s30, %s3787_s15  ;;  %p104_p8 = scmp.ne.s32.totalorder %s3528_s29, %s3524_s28 }
  0x76   : > { %p95_p4 = scmp.eq.s32.totalorder %s94_s23, 0  ;;  %p105_p13 = scmp.eq.s32.totalorder %s3532_s30, 0 }
  0x77   : > { %p3218_p6 = scmp.lt.s32.totalorder %s3532_s30, 2  ;;  %p4301_p3 = scmp.eq.s32.totalorder %s3668_s0, 1 }
  0x78   : > { %s3797_s13 = scalar_select %p95_p4, %s3528_s29, %s97_s12  }
  0x79   : > { %p106_p10 = por %p105_p13, %p104_p8  ;;  %p3801_p5 = por %p4301_p3, %p104_p8 }
  0x7a   : > { %4300 = sst [smem:[#allocation20_spill]] %s3797_s13  ;;  %s568_s20 = sand.u32 1, %s3528_s29  }
  0x7b   : > { %s2914_s22 = sshll.u32 %s3532_s30, 10  ;;  %s3807_s19 = sshll.u32 %s568_s20, 6 }
  0x7c   : > { %s4303_s17 = sld [smem:[#allocation23_spill]]  ;;  %s572_s25 = scalar_lea.vmem [#allocation2], %s3807_s19 }
  0x7d   : > { %s579_s11 = sshll.u32 %s572_s25, 4  ;;  %p3815_p11 = pnand %p3218_p6, %p106_p10  ;;  %s3819_s11 = int_to_ptr.vmem [resolvable:$true] %s579_s11 }
  0x7e   : > { %s3824_s24 = scalar_lea.hbm %s4246_s3, %s2914_s22  ;;  %s3826_s26 = scalar_lea.sflag [#allocation3], %s568_s20 }
  0x7f   : > { %p3396_p9 = pneg %p3815_p11 }
  0x82   : > { %s3812_s2 = scalar_lea.hbm %s4303_s17, %s2914_s22  ;;  %s3399_s10 = scalar_lea.hbm %s4303_s17, 2048 }
  0x83   : > { %s3394_s27 = scalar_lea.hbm %s3812_s2, 1024  ;;  %p3400_p1 = scmp.lt.u32.totalorder %s3812_s2, %s4303_s17 }
  0x84   : > { %p3395_p7 = scmp.ne.s32.totalorder %s3812_s2, %s3394_s27  ;;  %p3401_p2 = scmp.lt.u32.totalorder %s3399_s10, %s3394_s27 }
  0x85   : > { %p3403_p8 = scmp.lt.u32.totalorder %s3394_s27, %s3812_s2 }
  0x86   : > { %p3397_p12 = pnand %p3396_p9, %p3395_p7  ;;  %p3402_p4 = por %p3401_p2, %p3400_p1 }
  0x88   : > { %p3398_p0 = pneg %p3397_p12  ;;  %p3404_p13 = por %p3403_p8, %p3402_p4 }
  0x8a   : > { %p3405_p6 = pnand %p3404_p13, %p3398_p0 }
  0x8c   : > { %3408 = shalt.err (!%p3405_p6)
}
  0x8d   : > { %s3409_s18 = scalar_lea.vmem %s3819_s11, 1024  ;;  %s3539_s8 = smov [#allocation2]  }
  0x8e   : > { %p3410_p10 = scmp.ne.s32.totalorder %s3819_s11, %s3409_s18  ;;  %s3414_s20 = sshll.u32 %s3539_s8, 4  ;;  %s3415_s20 = int_to_ptr.vmem [resolvable:$false] %s3414_s20 }
  0x8f   : > { %s3416_s14 = scalar_lea.vmem %s3415_s20, 2048  ;;  %p3417_p12 = scmp.lt.s32.totalorder %s3819_s11, %s3415_s20 }
  0x90   : > { %p3412_p3 = pnand %p3410_p10, %p3396_p9  ;;  %p3418_p1 = scmp.lt.s32.totalorder %s3416_s14, %s3409_s18 }
  0x92   : > { %p3413_p7 = pneg %p3412_p3  ;;  %p3419_p2 = por %p3418_p1, %p3417_p12 }
  0x94   : > { %p3420_p4 = pnand %p3419_p2, %p3413_p7 }
  0x96   : > { %3423 = shalt.err (!%p3420_p4)
}
  0x97   : > { %s4305_s10 = smov 8   ;;  %s4306_s27 = smov 128  }
  0x98   : > { %3207 = dma.hbm_to_vmem [thread:$0]  (!%p3815_p11), %s3812_s2, 1024, %s3819_s11, %s3826_s26, %s4306_s27, %s4306_s27, %s4305_s10  }
  0x99   : > { %s593_s13 = scalar_lea.vmem [#allocation5], %s3807_s19  ;;  %s589_s12 = sand.u32 1, %s3532_s30  }
  0x9a   : > { %s600_s22 = sshll.u32 %s593_s13, 4  ;;  %s3861_s25 = scalar_lea.sflag [#allocation6], %s589_s12  ;;  %s3859_s22 = int_to_ptr.vmem [resolvable:$true] %s600_s22 }
  0x9b   : > { %s3424_s18 = scalar_lea.hbm %s3824_s24, 1024  ;;  %s3429_s14 = scalar_lea.hbm %s4246_s3, 2048 }
  0x9c   : > { %p3425_p0 = scmp.ne.s32.totalorder %s3824_s24, %s3424_s18  ;;  %p3430_p6 = scmp.lt.u32.totalorder %s3824_s24, %s4246_s3 }
  0x9d   : > { %p3431_p10 = scmp.lt.u32.totalorder %s3429_s14, %s3424_s18  ;;  %p3433_p7 = scmp.lt.u32.totalorder %s3424_s18, %s3824_s24 }
  0x9e   : > { %p3427_p8 = pnand %p3425_p0, %p3396_p9 }
  0x9f   : > { %p3432_p3 = por %p3431_p10, %p3430_p6 }
  0xa0   : > { %p3428_p13 = pneg %p3427_p8 }
  0xa1   : > { %p3434_p12 = por %p3433_p7, %p3432_p3 }
  0xa3   : > { %p3435_p1 = pnand %p3434_p12, %p3428_p13 }
  0xa5   : > { %3438 = shalt.err (!%p3435_p1)
}
  0xa6   : > { %s3439_s19 = scalar_lea.vmem %s3859_s22, 1024  ;;  %s3540_s2 = smov [#allocation5]  }
  0xa7   : > { %p3440_p2 = scmp.ne.s32.totalorder %s3859_s22, %s3439_s19  ;;  %s3444_s11 = sshll.u32 %s3540_s2, 4  ;;  %s3445_s11 = int_to_ptr.vmem [resolvable:$false] %s3444_s11 }
  0xa8   : > { %s3446_s29 = scalar_lea.vmem %s3445_s11, 2048  ;;  %p3447_p8 = scmp.lt.s32.totalorder %s3859_s22, %s3445_s11 }
  0xa9   : > { %p3442_p4 = pnand %p3440_p2, %p3396_p9  ;;  %p3448_p6 = scmp.lt.s32.totalorder %s3446_s29, %s3439_s19 }
  0xab   : > { %p3443_p0 = pneg %p3442_p4  ;;  %p3449_p10 = por %p3448_p6, %p3447_p8 }
  0xad   : > { %p3450_p3 = pnand %p3449_p10, %p3443_p0 }
  0xaf   : > { %3453 = shalt.err (!%p3450_p3)
}
  0xb0   : > { %3210 = dma.hbm_to_vmem [thread:$0]  (!%p3815_p11), %s3824_s24, 1024, %s3859_s22, %s3861_s25, %s4306_s27, %s4306_s27, %s4305_s10  }
  0xb1   : > { %p4307_p9 = scmp.ne.s32.totalorder %s4294_s21, 0 }
  0xb2   : > { %s3893_s17 = sand.u32 (!%p4307_p9), 1, %s3524_s28   ;;  %p4308_p13 = scmp.ne.s32.totalorder (!%p4307_p9), %s4291_s1, 0 }
  0xb3   : > { %612 = sbr.rel (%p4307_p9) target bundleno = 2835 (0xb13), region = 92  ;;  %s2856_s26 = sshll.u32 (!%p4307_p9), %s3893_s17, 6 }
  0xb4   : > { %s615_s13 = scalar_lea.sflag (!%p4307_p9), [#allocation3], %s3893_s17  ;;  %s3897_s12 = scalar_lea.vmem (!%p4307_p9), [#allocation2], %s2856_s26 }
  0xba   : > { %3499 = dma.done.wait (%p4308_p13), %s615_s13, 1024  }
  0xbb   : > { %3501 = vsyncadd (%p4308_p13), %s615_s13, 4294966272  ;;  %s623_s23 = sand.u32 1, %s3668_s0   ;;  %s3904_s24 = scalar_lea.vmem [#allocation5], %s2856_s26 }
  0xbc   : > { %s624_s21 = scalar_lea.sflag [#allocation6], %s623_s23 }
  0xbd   : > { %3503 = dma.done.wait (%p4308_p13), %s624_s21, 1024  }
  0xbe   : > { %3505 = vsyncadd (%p4308_p13), %s624_s21, 4294966272  ;;  %p4309_p11 = scmp.eq.s32.totalorder %s3668_s0, 0 }
  0xc0   : > { %3507 = dma.done.wait (%p4309_p11), [#allocation6], 512   ;;  %p4310_p7 = pmov %p4309_p11 }
  0xc2   : > { %3509 = vsyncadd (%p4310_p7), [#allocation6], 4294966784  ;;  %p4311_p12 = pmov %p4310_p7 }
  0xc3   : > { %p4312_p1 = pmov %p4310_p7 }
  0xc4   : > { %3511 = dma.done.wait (%p4311_p12), [#allocation9], 1024  }
  0xc5   : > { %3513 = vsyncadd (%p4312_p1), [#allocation9], 4294966272  ;;  %p707_p2 = scmp.lt.s32.totalorder %s3668_s0, 1  ;;  %s4313_s25 = sld [smem:[#allocation21_spill]]  ;;  %vm739_vm0 = vcmask 261120   ;;  %v785_v14 = vld [vmem:[%s4249_s6] sm:$0xff] }
  0xc6   : > { %v786_v15 = vld [vmem:[%s4249_s6 + $0x8] sm:$0xff]  ;;  %v787_v16 = vld [vmem:[%s4249_s6 + $0x10] sm:$0xff]  ;;  %v788_v18 = vld [vmem:[%s4249_s6 + $0x18] sm:$0xff]  ;;  %s4314_s22 = sld [smem:[#allocation22_spill]]  ;;  %v3541_v46 = vmov 0.0   ;;  %vm3542_vm1 = vmmov 0  }
  0xc7   : > { %s3920_s10 = scalar_select %p707_p2, %s3668_s0, 1  ;;  %v3128_v17 = vpack.c.bf16 %v786_v15, %v785_v14  ;;  %v3132_v19 = vpack.c.bf16 %v788_v18, %v787_v16  ;;  %v877_v20 = vld [vmem:[#allocation7] sm:$0xff]  ;;  %v878_v21 = vld [vmem:[#allocation7 + $0x8] sm:$0xff]  ;;  %v879_v41 = vld [vmem:[#allocation7 + $0x10] sm:$0xff]  ;;  %3007 = vmatprep.subr.mxu0 %v3541_v46  ;;  %3009 = vmatprep.mubr.msk.f32.mxu0 %vm3542_vm1, %v3541_v46  ;;  %vm1021_vm2 = vcmask 64512   ;;  %vm2342_vm3 = vcmask 130048  }
  0xc8   : > { %v3136_v22 = vpack.c.bf16 %v878_v21, %v877_v20  ;;  %v2866_v30 = vld [vmem:[%s4247_s4] ss:$0 sm:$0xff]  ;;  %v880_v42 = vld [vmem:[#allocation7 + $0x18] sm:$0xff]  ;;  %s3543_s20 = smov 112   ;;  %s3544_s14 = smov 120   ;;  %vm2345_vm4 = vcmask 195584  }
  0xc9   : > { %s2916_s1 = sshll.u32 %s3920_s10, 4  ;;  %3129 = vmatprep.subr.bf16.mxu1 %v3128_v17  ;;  %v2867_v32 = vld [vmem:[%s4248_s5] ss:$0 sm:$0xff]  ;;  %v3140_v45 = vpack.c.bf16 %v880_v42, %v879_v41  ;;  %s3545_s11 = smov 104   ;;  %v732_v41 = vld [vmem:[%s3904_s24 + $0x18] sm:$0xff]  ;;  %v726_v42 = vld [vmem:[%s3897_s12 + $0x28] sm:$0xff] }
  0xca   : > { %3131 = vmatpush3.bf16.msra.mxu1 %v3128_v17  ;;  %v2868_v47 = vld [vmem:[%s4250_s7] ss:$0 sm:$0xff]  ;;  %s3546_s29 = smov 96   ;;  %s3549_s26 = smov 24   ;;  %vm2595_vm5 = vcmask 523264  }
  0xcb   : > { %s711_s18 = scalar_lea.vmem %s4313_s25, %s2916_s1  ;;  %3133 = vmatprep.subr.bf16.mxu1 %v3132_v19  ;;  %v3981_v52 = vld [vmem:[%s4252_s9] ss:$0 sm:$0xff]  ;;  %s4315_s21 = sld [smem:[#allocation26_spill]] }
  0xcc   : > { %v3928_v0 = vld [vmem:[%s711_s18] sm:$0xff]  ;;  %v3930_v1 = vld [vmem:[%s711_s18 + $0x8] sm:$0xff]  ;;  %s716_s25 = scalar_lea.vmem %s4314_s22, %s2916_s1  ;;  %s4317_s13 = sld [smem:[#allocation27_spill]] }
  0xcd   : > { %v740_v2 = vsel %vm739_vm0, %v3928_v0, 0.0  ;;  %v743_v3 = vsel %vm739_vm0, %v3930_v1, 0.0  ;;  %v719_v35 = vld [vmem:[%s716_s25] sm:$0xff]  ;;  %v720_v40 = vld [vmem:[%s716_s25 + $0x8] sm:$0xff]  ;;  %s4316_s25 = sld [smem:[#allocation31_spill]]  ;;  %s4318_s27 = sld [smem:[#allocation28_spill]] }
  0xce   : > { %741 = vadd.xlane.f32.xlu0 %v740_v2  ;;  %3135 = vmatpush3.bf16.msra.mxu1 %v3132_v19  ;;  %v721_v17 = vld [vmem:[%s3897_s12] sm:$0xff]  ;;  %s2861_s19 = sshll.u32 %s3893_s17, 4  ;;  %s3550_s10 = smov [#allocation11]  }
  0xcf   : > { %3137 = vmatprep.subr.bf16.mxu1 %v3136_v22  ;;  %v729_v19 = vld [vmem:[%s3904_s24] sm:$0xff]  ;;  %s3458_s1 = sshll.u32 %s3550_s10, 4  ;;  %s3459_s1 = int_to_ptr.vmem [resolvable:$false] %s3458_s1 }
  0xd2   : > { %744 = vadd.xlane.f32.xlu0 %v743_v3 }
 0x15b   : > { %v742_v4 = vpop.xlane.xlu0 %741 }
 0x15c   : > { %v747_v5 = vmul.f32 0.03125, %v742_v4 }
 0x15e   : > { %v749_v6 = vsub.f32 %v3928_v0, %v747_v5 }
 0x15f   : > { %v745_v7 = vpop.xlane.xlu0 %744 }
 0x160   : > { %v748_v8 = vmul.f32 0.03125, %v745_v7  ;;  %v751_v9 = vmul.f32 %v749_v6, %v749_v6 }
 0x162   : > { %v750_v10 = vsub.f32 %v3930_v1, %v748_v8  ;;  %v753_v11 = vsel %vm739_vm0, %v751_v9, 0.0 }
 0x163   : > { %754 = vadd.xlane.f32.xlu1 %v753_v11 }
 0x164   : > { %v752_v12 = vmul.f32 %v750_v10, %v750_v10 }
 0x166   : > { %v756_v13 = vsel %vm739_vm0, %v752_v12, 0.0 }
 0x167   : > { %757 = vadd.xlane.f32.xlu1 %v756_v13 }
 0x1f0   : > { %v755_v23 = vpop.xlane.xlu1 %754 }
 0x1f1   : > { %v759_v24 = vmul.f32 0.03125, %v755_v23 }
 0x1f3   : > { %v761_v25 = vadd.f32 1e-05, %v759_v24  ;;  %v722_v24 = vld [vmem:[%s3897_s12 + $0x8] sm:$0xff] }
 0x1f4   : > { %v758_v26 = vpop.xlane.xlu1 %757 }
 0x1f5   : > { %3270 = vrsqrt.f32 %v761_v25  ;;  %v760_v27 = vmul.f32 0.03125, %v758_v26  ;;  %v730_v26 = vld [vmem:[%s3904_s24 + $0x8] sm:$0xff] }
 0x1f7   : > { %v762_v28 = vadd.f32 1e-05, %v760_v27 }
 0x1f9   : > { %3272 = vrsqrt.f32 %v762_v28 }
 0x1ff   : > { %v3271_v29 = vpop.eup %3270 }
 0x200   : > { %v765_v31 = vmul.f32 %v3271_v29, %v749_v6  ;;  %v723_v29 = vld [vmem:[%s3897_s12 + $0x10] sm:$0xff] }
 0x202   : > { %v773_v33 = vmul.f32 %v2866_v30, %v765_v31 }
 0x203   : > { %v3273_v34 = vpop.eup %3272 }
 0x204   : > { %v766_v36 = vmul.f32 %v3273_v34, %v750_v10  ;;  %v781_v37 = vadd.f32 %v2867_v32, %v773_v33  ;;  %v731_v34 = vld [vmem:[%s3904_s24 + $0x10] sm:$0xff] }
 0x206   : > { %v774_v38 = vmul.f32 %v2866_v30, %v766_v36  ;;  %v783_v39 = vadd.f32 %v781_v37, %v719_v35  ;;  %v724_v30 = vld [vmem:[%s3897_s12 + $0x18] sm:$0xff] }
 0x208   : > { %v782_v43 = vadd.f32 %v2867_v32, %v774_v38  ;;  %2993 = vmatprep.mubr.msk.f32.mxu1 %vm739_vm0, %v783_v39 }
 0x20a   : > { %v784_v44 = vadd.f32 %v782_v43, %v720_v40  ;;  %v725_v40 = vld [vmem:[%s3897_s12 + $0x20] sm:$0xff] }
 0x20c   : > { %2994 = vmatmul.mubr.msk.f32.vlgmr.msra.gmra.mrb[0].mxu1 %vm739_vm0, %v784_v44 }
 0x20d   : > { %3139 = vmatpush3.bf16.msra.mxu1 %v3136_v22  ;;  %3004 = vmatprep.mubr.msk.f32.mxu1 %vm739_vm0, %v781_v37 }
 0x20e   : > { %3141 = vmatprep.subr.bf16.mxu1 %v3140_v45 }
 0x211   : > { %3143 = vmatpush3.bf16.msra.mxu1 %v3140_v45 }
 0x212   : > { %3012 = vmatprep.subr.mxu1 %v3541_v46 }
 0x214   : > { %3005 = vmatmul.mubr.msk.f32.vlgmr.msra.gmra.mrb[2].mxu1 %vm739_vm0, %v782_v43 }
 0x215   : > { %3014 = vmatprep.mubr.msk.f32.mxu1 %vm3542_vm1, %v3541_v46 }
 0x2df   : > { %v2995_v48 = vpop.f32.mrb[0].mxu1 }
 0x2e0   : > { %v868_v49 = vpop.f32.mrb[1].mxu1  ;;  %v874_v51 = vadd.f32 %v2995_v48, %v2868_v47 }
 0x2e1   : > { %v869_v50 = vadd.f32 %v2868_v47, %v868_v49 }
 0x2e2   : > { %v970_v61 = vmul.f32 0.35355338, %v874_v51 }
 0x2e3   : > { %991 = vrot.lane.b32.xlu1 %v869_v50, %s3543_s20  ;;  %987 = vrot.lane.b32.xlu0 %v869_v50, %s3544_s14  ;;  %v969_v56 = vmul.f32 0.35355338, %v869_v50 }
 0x2e7   : > { %v3006_v53 = vpop.f32.mrb[2].mxu1  ;;  %995 = vrot.lane.b32.xlu1 %v869_v50, %s3545_s11  ;;  %993 = vrot.lane.b32.xlu0 %v874_v51, %s3543_s20 }
 0x2e8   : > { %v3986_v54 = vadd.f32 %v3006_v53, %v3981_v52  ;;  %v3988_v55 = vpop.f32.mrb[3].mxu1 }
 0x2e9   : > { %v4034_v15 = vadd.f32 %v3981_v52, %v3988_v55  ;;  %v733_v55 = vld [vmem:[%s3904_s24 + $0x20] sm:$0xff] }
 0x2eb   : > { %989 = vrot.lane.b32.xlu1 %v874_v51, %s3544_s14  ;;  %1019 = vrot.lane.b32.xlu0 %v869_v50, %s3546_s29  ;;  %v734_v50 = vld [vmem:[%s3904_s24 + $0x28] sm:$0xff] }
 0x2ef   : > { %997 = vrot.lane.b32.xlu1 %v874_v51, %s3545_s11  ;;  %973 = vrot.lane.b32.xlu0 %v969_v56, %s3544_s14 }
 0x2f3   : > { %1324 = vrot.lane.b32.xlu1 %v874_v51, %s3546_s29  ;;  %981 = vrot.lane.b32.xlu0 %v969_v56, %s3545_s11 }
 0x2f7   : > { %977 = vrot.lane.b32.xlu1 %v969_v56, %s3543_s20 }
 0x355   : > { %v992_v57 = vpop.permute.xlu1 %991  ;;  %v988_v58 = vpop.permute.xlu0 %987 }
 0x356   : > { %1096 = vrot.lane.b32.xlu1 %v988_v58, %s3546_s29 }
 0x359   : > { %v996_v59 = vpop.permute.xlu1 %995  ;;  %v994_v60 = vpop.permute.xlu0 %993 }
 0x35a   : > { %1172 = vrot.lane.b32.xlu1 %v992_v57, %s3546_s29  ;;  %1248 = vrot.lane.b32.xlu0 %v996_v59, %s3546_s29  ;;  %v727_v57 = vld [vmem:[%s3897_s12 + $0x30] sm:$0xff] }
 0x35d   : > { %v990_v62 = vpop.permute.xlu1 %989  ;;  %v1020_v63 = vpop.permute.xlu0 %1019 }
 0x35e   : > { %3008 = vmatpush3.xpose.msk.msra.mxu0 %vm1021_vm2, %v1020_v63  ;;  %975 = vrot.lane.b32.xlu1 %v970_v61, %s3544_s14 }
 0x35f   : > { %1400 = vrot.lane.b32.xlu0 %v990_v62, %s3546_s29  ;;  %3017 = vmatprep.subr.mxu0 %v3541_v46  ;;  %v736_v62 = vld [vmem:[%s3904_s24 + $0x38] sm:$0xff] }
 0x361   : > { %v998_v2 = vpop.permute.xlu1 %997  ;;  %3010 = vmatmul.mubr.msk.f32.vlgmr.msra.gmra.mrb[0].mxu0 %vm1021_vm2, %v969_v56  ;;  %v974_v4 = vpop.permute.xlu0 %973  ;;  %v728_v56 = vld [vmem:[%s3897_s12 + $0x38] sm:$0xff]  ;;  %s3547_s12 = smov 8  }
 0x362   : > { %1552 = vrot.lane.b32.xlu1 %v998_v2, %s3546_s29  ;;  %3019 = vmatprep.mubr.msk.f32.mxu0 %vm3542_vm1, %v3541_v46 }
 0x363   : > { %1476 = vrot.lane.b32.xlu0 %v994_v60, %s3546_s29  ;;  %s4320_s29 = sld [smem:[#allocation32_spill]] }
 0x365   : > { %v1325_v3 = vpop.permute.xlu1 %1324  ;;  %v982_v6 = vpop.permute.xlu0 %981 }
 0x366   : > { %983 = vrot.lane.b32.xlu1 %v970_v61, %s3545_s11 }
 0x367   : > { %979 = vrot.lane.b32.xlu0 %v970_v61, %s3543_s20 }
 0x369   : > { %v978_v5 = vpop.permute.xlu1 %977 }
 0x3c8   : > { %v1097_v7 = vpop.permute.xlu1 %1096 }
 0x3c9   : > { %3013 = vmatpush3.xpose.msk.msra.mxu1 %vm1021_vm2, %v1097_v7 }
 0x3ca   : > { %3022 = vmatprep.subr.mxu1 %v3541_v46 }
 0x3cc   : > { %v1173_v8 = vpop.permute.xlu1 %1172  ;;  %3015 = vmatmul.mubr.msk.f32.vlgmr.msra.gmra.mrb[4].mxu1 %vm1021_vm2, %v974_v4  ;;  %v1249_v9 = vpop.permute.xlu0 %1248 }
 0x3cd   : > { %3018 = vmatpush3.xpose.msk.msra.mxu0 %vm1021_vm2, %v1173_v8  ;;  %3023 = vmatpush3.xpose.msk.msra.mxu1 %vm1021_vm2, %v1249_v9 }
 0x3ce   : > { %3024 = vmatprep.mubr.msk.f32.mxu1 %vm3542_vm1, %v3541_v46  ;;  %3032 = vmatprep.subr.mxu1 %v3541_v46 }
 0x3cf   : > { %3027 = vmatprep.subr.mxu0 %v3541_v46 }
 0x3d0   : > { %v976_v10 = vpop.permute.xlu1 %975  ;;  %3025 = vmatmul.mubr.msk.f32.vlgmr.msra.gmra.mrb[6].mxu1 %vm1021_vm2, %v982_v6  ;;  %3020 = vmatmul.mubr.msk.f32.vlgmr.msra.gmra.mrb[2].mxu0 %vm1021_vm2, %v978_v5  ;;  %v735_v5 = vld [vmem:[%s3904_s24 + $0x30] sm:$0xff]  ;;  %s3548_s24 = smov 16  }
 0x3d1   : > { %v1401_v11 = vpop.permute.xlu0 %1400  ;;  %3028 = vmatpush3.xpose.msk.msra.mxu0 %vm1021_vm2, %v1325_v3  ;;  %3029 = vmatprep.mubr.msk.f32.mxu0 %vm3542_vm1, %v3541_v46 }
 0x3d2   : > { %3033 = vmatpush3.xpose.msk.msra.mxu1 %vm1021_vm2, %v1401_v11  ;;  %3034 = vmatprep.mubr.msk.f32.mxu1 %vm3542_vm1, %v3541_v46 }
 0x3d3   : > { %3042 = vmatprep.subr.mxu1 %v3541_v46  ;;  %3037 = vmatprep.subr.mxu0 %v3541_v46 }
 0x3d4   : > { %v1553_v12 = vpop.permute.xlu1 %1552  ;;  %3030 = vmatmul.mubr.msk.f32.vlgmr.msra.gmra.mrb[4].mxu0 %vm1021_vm2, %v970_v61 }
 0x3d5   : > { %3035 = vmatmul.mubr.msk.f32.vlgmr.msra.gmra.mrb[8].mxu1 %vm1021_vm2, %v976_v10  ;;  %v1477_v13 = vpop.permute.xlu0 %1476  ;;  %3039 = vmatprep.mubr.msk.f32.mxu0 %vm3542_vm1, %v3541_v46 }
 0x3d6   : > { %3038 = vmatpush3.xpose.msk.msra.mxu0 %vm1021_vm2, %v1477_v13  ;;  %3043 = vmatpush3.xpose.msk.msra.mxu1 %vm1021_vm2, %v1553_v12 }
 0x3d7   : > { %3044 = vmatprep.mubr.msk.f32.mxu1 %vm3542_vm1, %v3541_v46  ;;  %3047 = vmatprep.subr.mxu0 %v3541_v46 }
 0x3d8   : > { %v984_v14 = vpop.permute.xlu1 %983  ;;  %3052 = vmatprep.subr.mxu1 %v3541_v46 }
 0x3d9   : > { %v980_v16 = vpop.permute.xlu0 %979  ;;  %3045 = vmatmul.mubr.msk.f32.vlgmr.msra.gmra.mrb[10].mxu1 %vm1021_vm2, %v984_v14 }
 0x3da   : > { %3040 = vmatmul.mubr.msk.f32.vlgmr.msra.gmra.mrb[6].mxu0 %vm1021_vm2, %v980_v16  ;;  %3054 = vmatprep.mubr.msk.f32.mxu1 %vm3542_vm1, %v3541_v46 }
 0x3db   : > { %3048 = vmatpush3.msra.mxu0 %v4034_v15  ;;  %3049 = vmatprep.mubr.msk.f32.mxu0 %vm3542_vm1, %v3541_v46 }
 0x3dc   : > { %3057 = vmatprep.subr.mxu0 %v3541_v46 }
 0x434   : > { %v1092_v18 = vpop.f32.mrb[0].mxu0 }
 0x435   : > { %v1628_v20 = vmul.f32 %v1092_v18, %v721_v17  ;;  %v3011_v21 = vpop.f32.mrb[1].mxu0 }
 0x437   : > { %v4046_v22 = vadd.f32 %v1628_v20, %v729_v19 }
 0x439   : > { %v1644_v23 = vsel %vm1021_vm2, %v4046_v22, -inf }
 0x43a   : > { %1645 = vmax.xlane.f32.xlu0 %v1644_v23 }
 0x49f   : > { %v1168_v25 = vpop.f32.mrb[4].mxu1 }
 0x4a0   : > { %v1629_v27 = vmul.f32 %v1168_v25, %v722_v24  ;;  %v3016_v28 = vpop.f32.mrb[5].mxu1 }
 0x4a2   : > { %v1637_v31 = vadd.f32 %v1629_v27, %v730_v26 }
 0x4a3   : > { %v1244_v32 = vpop.f32.mrb[2].mxu0  ;;  %v1320_v33 = vpop.f32.mrb[6].mxu1 }
 0x4a4   : > { %v1630_v35 = vmul.f32 %v1244_v32, %v723_v29  ;;  %v1631_v36 = vmul.f32 %v1320_v33, %v724_v30  ;;  %v3021_v37 = vpop.f32.mrb[3].mxu0  ;;  %v3026_v38 = vpop.f32.mrb[7].mxu1  ;;  %v1647_v39 = vsel %vm1021_vm2, %v1637_v31, -inf }
 0x4a5   : > { %1648 = vmax.xlane.f32.xlu1 %v1647_v39 }
 0x4a6   : > { %v1638_v43 = vadd.f32 %v1630_v35, %v731_v34  ;;  %v1639_v51 = vadd.f32 %v1631_v36, %v732_v41 }
 0x4a7   : > { %v1396_v44 = vpop.f32.mrb[4].mxu0 }
 0x4a8   : > { %v1632_v45 = vmul.f32 %v1396_v44, %v725_v40  ;;  %v1472_v47 = vpop.f32.mrb[8].mxu1  ;;  %v3031_v48 = vpop.f32.mrb[5].mxu0  ;;  %v1650_v49 = vsel %vm1021_vm2, %v1638_v43, -inf  ;;  %v1653_v60 = vsel %vm1021_vm2, %v1639_v51, -inf }
 0x4a9   : > { %v1633_v52 = vmul.f32 %v1472_v47, %v726_v42  ;;  %v3036_v53 = vpop.f32.mrb[9].mxu1  ;;  %1651 = vmax.xlane.f32.xlu0 %v1650_v49 }
 0x4aa   : > { %v1640_v61 = vadd.f32 %v1632_v45, %v733_v55 }
 0x4ab   : > { %v1641_v58 = vadd.f32 %v1633_v52, %v734_v50 }
 0x4ac   : > { %v1624_v59 = vpop.f32.mrb[10].mxu1  ;;  %v1656_v9 = vsel %vm1021_vm2, %v1640_v61, -inf }
 0x4ad   : > { %v1548_v63 = vpop.f32.mrb[6].mxu0  ;;  %v1635_v2 = vmul.f32 %v1624_v59, %v728_v56  ;;  %v1659_v3 = vsel %vm1021_vm2, %v1641_v58, -inf  ;;  %v3046_v4 = vpop.f32.mrb[11].mxu1  ;;  %1654 = vmax.xlane.f32.xlu0 %v1653_v60 }
 0x4ae   : > { %v1634_v6 = vmul.f32 %v1548_v63, %v727_v57  ;;  %1660 = vmax.xlane.f32.xlu1 %v1659_v3  ;;  %v3041_v7 = vpop.f32.mrb[7].mxu0 }
 0x4af   : > { %v1643_v8 = vadd.f32 %v1635_v2, %v736_v62 }
 0x4b0   : > { %v1642_v10 = vadd.f32 %v1634_v6, %v735_v5 }
 0x4b1   : > { %1657 = vmax.xlane.f32.xlu0 %v1656_v9  ;;  %v1665_v11 = vsel %vm1021_vm2, %v1643_v8, -inf }
 0x4b2   : > { %1666 = vmax.xlane.f32.xlu1 %v1665_v11  ;;  %v1662_v12 = vsel %vm1021_vm2, %v1642_v10, -inf }
 0x4b5   : > { %1663 = vmax.xlane.f32.xlu0 %v1662_v12 }
 0x4c3   : > { %1007 = vrot.lane.b32.xlu1 %v4034_v15, %s3543_s20 }
 0x4c7   : > { %1013 = vrot.lane.b32.xlu1 %v4034_v15, %s3545_s11  ;;  %v1646_v13 = vpop.xlane.xlu0 %1645 }
 0x4c8   : > { %v1668_v14 = vsub.f32 %v4046_v22, %v1646_v13 }
 0x4ca   : > { %v1676_v16 = vmul.f32 1.442695, %v1668_v14 }
 0x4cb   : > { %1003 = vrot.lane.b32.xlu1 %v3986_v54, %s3544_s14  ;;  %1001 = vrot.lane.b32.xlu0 %v4034_v15, %s3544_s14  ;;  %s4319_s14 = sld [smem:[#allocation30_spill]] }
 0x4cc   : > { %3274 = vpow2.f32 %v1676_v16 }
 0x4d6   : > { %v3275_v17 = vpop.eup %3274 }
 0x4d7   : > { %v1692_v18 = vsel %vm1021_vm2, %v3275_v17, 0.0 }
 0x4ea   : > { %1693 = vadd.xlane.f32.xlu0 %v1692_v18 }
 0x532   : > { %v1649_v19 = vpop.xlane.xlu1 %1648 }
 0x533   : > { %v1669_v20 = vsub.f32 %v1637_v31, %v1649_v19 }
 0x535   : > { %v1678_v21 = vmul.f32 1.442695, %v1669_v20 }
 0x536   : > { %v1652_v23 = vpop.xlane.xlu0 %1651 }
 0x537   : > { %3276 = vpow2.f32 %v1678_v21  ;;  %v1670_v24 = vsub.f32 %v1638_v43, %v1652_v23 }
 0x539   : > { %v1680_v25 = vmul.f32 1.442695, %v1670_v24 }
 0x53a   : > { %v1655_v26 = vpop.xlane.xlu0 %1654 }
 0x53b   : > { %3278 = vpow2.f32 %v1680_v25  ;;  %v1661_v27 = vpop.xlane.xlu1 %1660  ;;  %v1671_v15 = vsub.f32 %v1639_v51, %v1655_v26 }
 0x53c   : > { %v1673_v28 = vsub.f32 %v1641_v58, %v1661_v27  ;;  %v2348_v27 = vld [vmem:[#allocation8] sm:$0xff] }
 0x53d   : > { %v1682_v29 = vmul.f32 1.442695, %v1671_v15  ;;  %v2349_v15 = vld [vmem:[#allocation8 + $0x8] sm:$0xff] }
 0x53e   : > { %v1686_v22 = vmul.f32 1.442695, %v1673_v28  ;;  %v1658_v30 = vpop.xlane.xlu0 %1657 }
 0x53f   : > { %3280 = vpow2.f32 %v1682_v29  ;;  %v1672_v32 = vsub.f32 %v1640_v61, %v1658_v30  ;;  %v1667_v33 = vpop.xlane.xlu1 %1666  ;;  %v3144_v29 = vpack.c.bf16 %v2349_v15, %v2348_v27  ;;  %v2350_v30 = vld [vmem:[#allocation8 + $0x10] sm:$0xff] }
 0x540   : > { %v1675_v34 = vsub.f32 %v1643_v8, %v1667_v33  ;;  %3282 = vpow2.f32 %v1686_v22 }
 0x541   : > { %v3277_v35 = vpop.eup %3276  ;;  %v1684_v31 = vmul.f32 1.442695, %v1672_v32  ;;  %v2351_v32 = vld [vmem:[#allocation8 + $0x18] sm:$0xff] }
 0x542   : > { %v1690_v36 = vmul.f32 1.442695, %v1675_v34  ;;  %v1664_v37 = vpop.xlane.xlu0 %1663  ;;  %v1695_v38 = vsel %vm1021_vm2, %v3277_v35, 0.0  ;;  %v3148_v33 = vpack.c.bf16 %v2351_v32, %v2350_v30 }
 0x543   : > { %3284 = vpow2.f32 %v1684_v31  ;;  %v1674_v39 = vsub.f32 %v1642_v10, %v1664_v37  ;;  %1696 = vadd.xlane.f32.xlu1 %v1695_v38  ;;  %v1008_v59 = vpop.permute.xlu1 %1007 }
 0x544   : > { %3286 = vpow2.f32 %v1690_v36 }
 0x545   : > { %v3279_v40 = vpop.eup %3278  ;;  %v1688_v41 = vmul.f32 1.442695, %v1674_v39 }
 0x546   : > { %v1002_v42 = vpop.permute.xlu0 %1001  ;;  %v1698_v43 = vsel %vm1021_vm2, %v3279_v40, 0.0 }
 0x547   : > { %3288 = vpow2.f32 %v1688_v41  ;;  %1699 = vadd.xlane.f32.xlu0 %v1698_v43  ;;  %3053 = vmatpush3.msra.mxu1 %v1002_v42  ;;  %v1014_v60 = vpop.permute.xlu1 %1013 }
 0x548   : > { %3062 = vmatprep.subr.mxu1 %v3541_v46 }
 0x549   : > { %v3281_v44 = vpop.eup %3280 }
 0x54a   : > { %v1701_v45 = vsel %vm1021_vm2, %v3281_v44, 0.0  ;;  %v3283_v47 = vpop.eup %3282 }
 0x54b   : > { %1702 = vadd.xlane.f32.xlu1 %v1701_v45  ;;  %v1707_v49 = vsel %vm1021_vm2, %v3283_v47, 0.0  ;;  %v1004_v61 = vpop.permute.xlu1 %1003 }
 0x54d   : > { %v3285_v48 = vpop.eup %3284 }
 0x54e   : > { %v1704_v50 = vsel %vm1021_vm2, %v3285_v48, 0.0  ;;  %v4087_v51 = vpop.eup %3286 }
 0x54f   : > { %1708 = vadd.xlane.f32.xlu1 %v1707_v49  ;;  %1705 = vadd.xlane.f32.xlu0 %v1704_v50  ;;  %v1713_v53 = vsel %vm1021_vm2, %v4087_v51, 0.0 }
 0x551   : > { %v4089_v52 = vpop.eup %3288 }
 0x552   : > { %v1710_v55 = vsel %vm1021_vm2, %v4089_v52, 0.0 }
 0x553   : > { %1714 = vadd.xlane.f32.xlu1 %v1713_v53  ;;  %1711 = vadd.xlane.f32.xlu0 %v1710_v55 }
 0x564   : > { %1015 = vrot.lane.b32.xlu1 %v3986_v54, %s3545_s11 }
 0x569   : > { %1009 = vrot.lane.b32.xlu0 %v3986_v54, %s3543_s20  ;;  %s3460_s20 = scalar_lea.vmem %s3459_s1, 512 }
 0x577   : > { %v1694_v56 = vpop.xlane.xlu0 %1693 }
 0x578   : > { %3290 = vrcp.f32 %v1694_v56 }
 0x582   : > { %v3291_v57 = vpop.eup %3290 }
 0x583   : > { %v1717_v58 = vmul.f32 %v3291_v57, %v3275_v17  ;;  %v2898_v57 = vld [vmem:[%s4315_s21] ss:$0 sm:$0xff] }
 0x585   : > { %3050 = vmatmul.mubr.msk.f32.vlgmr.msra.gmra.mrb[8].mxu0 %vm1021_vm2, %v1717_v58 }
 0x586   : > { %3058 = vmatpush3.msra.mxu0 %v1008_v59  ;;  %3059 = vmatprep.mubr.msk.f32.mxu0 %vm3542_vm1, %v3541_v46 }
 0x587   : > { %3067 = vmatprep.subr.mxu0 %v3541_v46 }
 0x5d0   : > { %v1697_v62 = vpop.xlane.xlu1 %1696 }
 0x5d1   : > { %3292 = vrcp.f32 %v1697_v62 }
 0x5d4   : > { %v1700_v63 = vpop.xlane.xlu0 %1699 }
 0x5d5   : > { %3294 = vrcp.f32 %v1700_v63 }
 0x5d8   : > { %v1703_v2 = vpop.xlane.xlu1 %1702 }
 0x5d9   : > { %3296 = vrcp.f32 %v1703_v2 }
 0x5db   : > { %v3293_v3 = vpop.eup %3292 }
 0x5dc   : > { %v1719_v4 = vmul.f32 %v3293_v3, %v3277_v35  ;;  %v1709_v5 = vpop.xlane.xlu1 %1708  ;;  %v1706_v6 = vpop.xlane.xlu0 %1705 }
 0x5dd   : > { %3298 = vrcp.f32 %v1709_v5 }
 0x5de   : > { %3300 = vrcp.f32 %v1706_v6  ;;  %3055 = vmatmul.mubr.msk.f32.vlgmr.msra.gmra.mrb[12].mxu1 %vm1021_vm2, %v1719_v4 }
 0x5df   : > { %v3295_v7 = vpop.eup %3294  ;;  %3063 = vmatpush3.msra.mxu1 %v1014_v60  ;;  %3064 = vmatprep.mubr.msk.f32.mxu1 %vm3542_vm1, %v3541_v46 }
 0x5e0   : > { %v1721_v8 = vmul.f32 %v3295_v7, %v3279_v40  ;;  %v1715_v9 = vpop.xlane.xlu1 %1714  ;;  %v1712_v10 = vpop.xlane.xlu0 %1711  ;;  %3072 = vmatprep.subr.mxu1 %v3541_v46 }
 0x5e1   : > { %3302 = vrcp.f32 %v1715_v9 }
 0x5e2   : > { %3304 = vrcp.f32 %v1712_v10  ;;  %3060 = vmatmul.mubr.msk.f32.vlgmr.msra.gmra.mrb[10].mxu0 %vm1021_vm2, %v1721_v8 }
 0x5e3   : > { %v3297_v11 = vpop.eup %3296  ;;  %3068 = vmatpush3.msra.mxu0 %v3986_v54  ;;  %3069 = vmatprep.mubr.msk.f32.mxu0 %vm3542_vm1, %v3541_v46 }
 0x5e4   : > { %v1723_v12 = vmul.f32 %v3297_v11, %v3281_v44  ;;  %3077 = vmatprep.subr.mxu0 %v3541_v46  ;;  %v1016_v18 = vpop.permute.xlu1 %1015  ;;  %v1010_v19 = vpop.permute.xlu0 %1009 }
 0x5e6   : > { %3065 = vmatmul.mubr.msk.f32.vlgmr.msra.gmra.mrb[14].mxu1 %vm1021_vm2, %v1723_v12  ;;  %v2486_v12 = vld [vmem:[#allocation10] sm:$0xff] }
 0x5e7   : > { %v3299_v13 = vpop.eup %3298  ;;  %3073 = vmatpush3.msra.mxu1 %v1004_v61  ;;  %3074 = vmatprep.mubr.msk.f32.mxu1 %vm3542_vm1, %v3541_v46 }
 0x5e8   : > { %v3301_v14 = vpop.eup %3300  ;;  %v1727_v16 = vmul.f32 %v3299_v13, %v3283_v47  ;;  %3082 = vmatprep.subr.mxu1 %v3541_v46  ;;  %v2487_v13 = vld [vmem:[#allocation10 + $0x8] sm:$0xff] }
 0x5e9   : > { %v1725_v17 = vmul.f32 %v3301_v14, %v3285_v48  ;;  %v3152_v14 = vpack.c.bf16 %v2487_v13, %v2486_v12 }
 0x5ea   : > { %3075 = vmatmul.mubr.msk.f32.vlgmr.msra.gmra.mrb[16].mxu1 %vm1021_vm2, %v1727_v16  ;;  %v2488_v16 = vld [vmem:[#allocation10 + $0x10] sm:$0xff] }
 0x5eb   : > { %v3303_v54 = vpop.eup %3302  ;;  %3070 = vmatmul.mubr.msk.f32.vlgmr.msra.gmra.mrb[12].mxu0 %vm1021_vm2, %v1725_v17  ;;  %3083 = vmatpush3.msra.mxu1 %v1016_v18  ;;  %v2489_v17 = vld [vmem:[#allocation10 + $0x18] sm:$0xff] }
 0x5ec   : > { %v3305_v20 = vpop.eup %3304  ;;  %v1731_v21 = vmul.f32 %v3303_v54, %v4087_v51  ;;  %3078 = vmatpush3.msra.mxu0 %v1010_v19  ;;  %3079 = vmatprep.mubr.msk.f32.mxu0 %vm3542_vm1, %v3541_v46  ;;  %v3156_v18 = vpack.c.bf16 %v2489_v17, %v2488_v16  ;;  %v2580_v54 = vld [vmem:[%s4316_s25] sm:$0xff]  ;;  %v2581_v19 = vld [vmem:[%s4316_s25 + $0x8] sm:$0xff] }
 0x5ed   : > { %v1729_v23 = vmul.f32 %v3305_v20, %v4089_v52  ;;  %3084 = vmatprep.mubr.msk.f32.mxu1 %vm3542_vm1, %v3541_v46  ;;  %3145 = vmatprep.subr.bf16.mxu0 %v3144_v29  ;;  %v2582_v20 = vld [vmem:[%s4316_s25 + $0x10] sm:$0xff] }
 0x5ee   : > { %3085 = vmatmul.mubr.msk.f32.vlgmr.msra.gmra.mrb[18].mxu1 %vm1021_vm2, %v1731_v21  ;;  %3153 = vmatprep.subr.bf16.mxu1 %v3152_v14  ;;  %v3160_v21 = vpack.c.bf16 %v2581_v19, %v2580_v54 }
 0x5ef   : > { %3080 = vmatmul.mubr.msk.f32.vlgmr.msra.gmra.mrb[14].mxu0 %vm1021_vm2, %v1729_v23  ;;  %3155 = vmatpush3.bf16.msra.mxu1 %v3152_v14  ;;  %v2583_v23 = vld [vmem:[%s4316_s25 + $0x18] sm:$0xff] }
 0x5f0   : > { %3147 = vmatpush3.bf16.msra.mxu0 %v3144_v29  ;;  %3157 = vmatprep.subr.bf16.mxu1 %v3156_v18 }
 0x5f1   : > { %3149 = vmatprep.subr.bf16.mxu0 %v3148_v33 }
 0x5f3   : > { %3159 = vmatpush3.bf16.msra.mxu1 %v3156_v18 }
 0x5f4   : > { %3151 = vmatpush3.bf16.msra.mxu0 %v3148_v33  ;;  %v2901_v33 = vld [vmem:[%s4317_s13] ss:$0 sm:$0xff] }
 0x5f5   : > { %3161 = vmatprep.subr.bf16.mxu0 %v3160_v21 }
 0x658   : > { %v1801_v24 = vpop.f32.mrb[8].mxu0 }
 0x659   : > { %v3051_v25 = vpop.f32.mrb[9].mxu0 }
 0x65a   : > { %v2584_v25 = vld [vmem:[%s4316_s25 + $0x20] sm:$0xff] }
 0x6b1   : > { %v1874_v26 = vpop.f32.mrb[12].mxu1 }
 0x6b2   : > { %2318 = vrot.lane.b32.xlu0 %v1874_v26, %s3547_s12  ;;  %v3056_v28 = vpop.f32.mrb[13].mxu1  ;;  %v2585_v26 = vld [vmem:[%s4316_s25 + $0x28] sm:$0xff] }
 0x6b3   : > { %v3168_v27 = vpack.c.bf16 %v2585_v26, %v2584_v25 }
 0x6b5   : > { %v1947_v22 = vpop.f32.mrb[10].mxu0 }
 0x6b6   : > { %2326 = vrot.lane.b32.xlu0 %v1947_v22, %s3548_s24  ;;  %v3061_v46 = vpop.f32.mrb[11].mxu0 }
 0x6b9   : > { %v2020_v34 = vpop.f32.mrb[14].mxu1 }
 0x6ba   : > { %v3066_v35 = vpop.f32.mrb[15].mxu1  ;;  %2334 = vrot.lane.b32.xlu0 %v2020_v34, %s3549_s26 }
 0x6bb   : > { %v2902_v35 = vld [vmem:[%s4318_s27] ss:$0 sm:$0xff]  ;;  %s4321_s27 = sld [smem:[#allocation33_spill]] }
 0x6bd   : > { %v2166_v31 = vpop.f32.mrb[16].mxu1 }
 0x6be   : > { %v2093_v36 = vpop.f32.mrb[12].mxu0  ;;  %2320 = vrot.lane.b32.xlu1 %v2166_v31, %s3547_s12  ;;  %v3076_v37 = vpop.f32.mrb[17].mxu1 }
 0x6bf   : > { %v3071_v38 = vpop.f32.mrb[13].mxu0 }
 0x6c1   : > { %v2312_v39 = vpop.f32.mrb[18].mxu1  ;;  %s4322_s22 = smov %s4321_s27 }
 0x6c2   : > { %v2239_v40 = vpop.f32.mrb[14].mxu0  ;;  %v3086_v41 = vpop.f32.mrb[19].mxu1 }
 0x6c3   : > { %2328 = vrot.lane.b32.xlu1 %v2239_v40, %s3548_s24  ;;  %v3081_v42 = vpop.f32.mrb[15].mxu0  ;;  %v2586_v41 = vld [vmem:[%s4316_s25 + $0x30] sm:$0xff]  ;;  %s2918_s24 = sshll.u32 %s3668_s0, 8  ;;  %s2682_s0 = scalar_lea.sflag [#allocation4], %s3893_s17 }
 0x6c4   : > { %v2587_v42 = vld [vmem:[%s4316_s25 + $0x38] sm:$0xff]  ;;  %s4193_s18 = scalar_lea.hbm %s4321_s27, %s2918_s24 }
 0x6c7   : > { %2336 = vrot.lane.b32.xlu1 %v2312_v39, %s3549_s26  ;;  %s706_s26 = scalar_lea.vmem [#allocation11], %s2861_s19 }
 0x6c8   : > { %s2695_s13 = sshll.u32 %s706_s26, 4  ;;  %s4196_s13 = int_to_ptr.vmem [resolvable:$true] %s2695_s13 }
 0x6c9   : > { %s3454_s8 = scalar_lea.vmem %s4196_s13, 256  ;;  %p3461_p6 = scmp.lt.s32.totalorder %s4196_s13, %s3459_s1 }
 0x6ca   : > { %p3455_p4 = scmp.ne.s32.totalorder %s4196_s13, %s3454_s8  ;;  %p3462_p10 = scmp.lt.s32.totalorder %s3460_s20, %s3454_s8 }
 0x6cc   : > { %p3456_p0 = pnand %p3455_p4, %p3801_p5  ;;  %p3463_p3 = por %p3462_p10, %p3461_p6 }
 0x6ce   : > { %p3457_p8 = pneg %p3456_p0 }
 0x6d0   : > { %p3464_p9 = pnand %p3463_p3, %p3457_p8 }
 0x724   : > { %v2319_v43 = vpop.permute.xlu0 %2318 }
 0x725   : > { %v2340_v45 = vsel %vm1021_vm2, %v1801_v24, %v2319_v43  ;;  %v3164_v24 = vpack.c.bf16 %v2583_v23, %v2582_v20  ;;  %v3172_v43 = vpack.c.bf16 %v2587_v42, %v2586_v41 }
 0x728   : > { %v2327_v44 = vpop.permute.xlu0 %2326 }
 0x729   : > { %v2343_v47 = vsel %vm2342_vm3, %v2340_v45, %v2327_v44  ;;  %v2903_v44 = vld [vmem:[%s4319_s14] ss:$0 sm:$0xff] }
 0x72c   : > { %v2335_v48 = vpop.permute.xlu0 %2334 }
 0x72d   : > { %v2346_v49 = vsel %vm2345_vm4, %v2343_v47, %v2335_v48 }
 0x72e   : > { %3095 = vmatprep.mubr.msk.f32.mxu0 %vm739_vm0, %v2346_v49 }
 0x730   : > { %v2321_v50 = vpop.permute.xlu1 %2320 }
 0x731   : > { %v2341_v52 = vsel %vm1021_vm2, %v2093_v36, %v2321_v50 }
 0x735   : > { %v2329_v51 = vpop.permute.xlu1 %2328 }
 0x736   : > { %v2344_v53 = vsel %vm2342_vm3, %v2341_v52, %v2329_v51  ;;  %v2906_v52 = vld [vmem:[%s4320_s29] ss:$0 sm:$0xff] }
 0x739   : > { %v2337_v55 = vpop.permute.xlu1 %2336 }
 0x73a   : > { %v2347_v56 = vsel %vm2345_vm4, %v2344_v53, %v2337_v55 }
 0x73b   : > { %3096 = vmatmul.mubr.msk.f32.vlgmr.msra.gmra.mrb[16].mxu0 %vm739_vm0, %v2347_v56 }
 0x73c   : > { %3163 = vmatpush3.bf16.msra.mxu0 %v3160_v21 }
 0x73d   : > { %3165 = vmatprep.subr.bf16.mxu0 %v3164_v24 }
 0x740   : > { %3167 = vmatpush3.bf16.msra.mxu0 %v3164_v24 }
 0x741   : > { %3169 = vmatprep.subr.bf16.mxu0 %v3168_v27 }
 0x744   : > { %3171 = vmatpush3.bf16.msra.mxu0 %v3168_v27 }
 0x745   : > { %3173 = vmatprep.subr.bf16.mxu0 %v3172_v43 }
 0x748   : > { %3175 = vmatpush3.bf16.msra.mxu0 %v3172_v43 }
 0x80e   : > { %v3097_v58 = vpop.f32.mrb[16].mxu0 }
 0x80f   : > { %v2437_v59 = vadd.f32 %v3097_v58, %v2898_v57  ;;  %v2431_v60 = vpop.f32.mrb[17].mxu0 }
 0x810   : > { %v2432_v61 = vadd.f32 %v2898_v57, %v2431_v60 }
 0x811   : > { %v4136_v62 = vadd.f32 %v2437_v59, %v3930_v1 }
 0x812   : > { %v4139_v63 = vadd.f32 %v2432_v61, %v3928_v0 }
 0x813   : > { %v2447_v2 = vsel %vm739_vm0, %v4136_v62, 0.0 }
 0x814   : > { %2448 = vadd.xlane.f32.xlu1 %v2447_v2  ;;  %v2444_v3 = vsel %vm739_vm0, %v4139_v63, 0.0 }
 0x815   : > { %2445 = vadd.xlane.f32.xlu0 %v2444_v3 }
 0x8a1   : > { %v2449_v4 = vpop.xlane.xlu1 %2448 }
 0x8a2   : > { %v2451_v5 = vmul.f32 0.03125, %v2449_v4  ;;  %v2446_v6 = vpop.xlane.xlu0 %2445 }
 0x8a3   : > { %v2450_v7 = vmul.f32 0.03125, %v2446_v6 }
 0x8a4   : > { %v2453_v8 = vsub.f32 %v4136_v62, %v2451_v5 }
 0x8a5   : > { %v2452_v1 = vsub.f32 %v4139_v63, %v2450_v7 }
 0x8a6   : > { %v2455_v10 = vmul.f32 %v2453_v8, %v2453_v8 }
 0x8a7   : > { %v2454_v9 = vmul.f32 %v2452_v1, %v2452_v1 }
 0x8a8   : > { %v2459_v11 = vsel %vm739_vm0, %v2455_v10, 0.0 }
 0x8a9   : > { %v2456_v0 = vsel %vm739_vm0, %v2454_v9, 0.0 }
 0x8aa   : > { %2457 = vadd.xlane.f32.xlu0 %v2456_v0 }
 0x8ae   : > { %2460 = vadd.xlane.f32.xlu0 %v2459_v11 }
 0x937   : > { %v2458_v15 = vpop.xlane.xlu0 %2457 }
 0x938   : > { %v2462_v28 = vmul.f32 0.03125, %v2458_v15 }
 0x93a   : > { %v2464_v29 = vadd.f32 1e-05, %v2462_v28 }
 0x93b   : > { %v2461_v22 = vpop.xlane.xlu0 %2460 }
 0x93c   : > { %3306 = vrsqrt.f32 %v2464_v29  ;;  %v2463_v30 = vmul.f32 0.03125, %v2461_v22 }
 0x93e   : > { %v2465_v32 = vadd.f32 1e-05, %v2463_v30 }
 0x940   : > { %3308 = vrsqrt.f32 %v2465_v32 }
 0x946   : > { %v3307_v46 = vpop.eup %3306 }
 0x947   : > { %v2468_v34 = vmul.f32 %v3307_v46, %v2452_v1 }
 0x949   : > { %v2476_v31 = vmul.f32 %v2901_v33, %v2468_v34 }
 0x94a   : > { %v3309_v36 = vpop.eup %3308 }
 0x94b   : > { %v2469_v37 = vmul.f32 %v3309_v36, %v2453_v8  ;;  %v2484_v38 = vadd.f32 %v2902_v35, %v2476_v31 }
 0x94d   : > { %v2477_v39 = vmul.f32 %v2901_v33, %v2469_v37  ;;  %3106 = vmatprep.mubr.msk.f32.mxu1 %vm739_vm0, %v2484_v38 }
 0x94f   : > { %v2485_v40 = vadd.f32 %v2902_v35, %v2477_v39 }
 0x951   : > { %3107 = vmatmul.mubr.msk.f32.vlgmr.msra.gmra.mrb[20].mxu1 %vm739_vm0, %v2485_v40 }
 0xa24   : > { %v3108_v45 = vpop.f32.mrb[20].mxu1 }
 0xa25   : > { %v2575_v47 = vadd.f32 %v3108_v45, %v2903_v44  ;;  %v2569_v48 = vpop.f32.mrb[21].mxu1 }
 0xa26   : > { %v2570_v49 = vadd.f32 %v2903_v44, %v2569_v48 }
 0xa27   : > { %v2579_v51 = vmax.f32 %v2575_v47, 0.0 }
 0xa28   : > { %v2578_v50 = vmax.f32 %v2570_v49, 0.0 }
 0xa2a   : > { %3125 = vmatprep.mubr.msk.f32.mxu0 %vm2595_vm5, %v2578_v50 }
 0xa2b   : > { %3126 = vmatmul.mubr.msk.f32.vlgmr.msra.gmra.mrb[18].mxu0 %vm2595_vm5, %v2579_v51 }
 0xafe   : > { %v3127_v53 = vpop.f32.mrb[18].mxu0 }
 0xaff   : > { %v2674_v55 = vadd.f32 %v3127_v53, %v2906_v52  ;;  %v2668_v56 = vpop.f32.mrb[19].mxu0 }
 0xb00   : > { %v2669_v57 = vadd.f32 %v2906_v52, %v2668_v56 }
 0xb01   : > { %v2678_v58 = vadd.f32 %v2674_v55, %v4136_v62 }
 0xb02   : > { %v2677_v59 = vadd.f32 %v2669_v57, %v4139_v63 }
 0xb03   : > { %2680 = vst.msk [vmem:[%s706_s26 + $0x8] sm:$0xff] %vm739_vm0, %v2678_v58 }
 0xb04   : > { %2679 = vst.msk [vmem:[%s706_s26] sm:$0xff] %vm739_vm0, %v2677_v59 }
 0xb05   : > { %3467 = shalt.err (!%p3464_p9)
}
 0xb06   : > { %s3468_s14 = scalar_lea.hbm %s4193_s18, 256  ;;  %s3472_s11 = scalar_lea.hbm %s4322_s22, 512 }
 0xb07   : > { %p3469_p13 = scmp.ne.s32.totalorder %s4193_s18, %s3468_s14  ;;  %p3473_p12 = scmp.lt.u32.totalorder %s4193_s18, %s4322_s22 }
 0xb08   : > { %p3474_p1 = scmp.lt.u32.totalorder %s3472_s11, %s3468_s14  ;;  %p3476_p4 = scmp.lt.u32.totalorder %s3468_s14, %s4193_s18 }
 0xb09   : > { %p3470_p11 = pnand %p3469_p13, %p3801_p5 }
 0xb0a   : > { %p3475_p2 = por %p3474_p1, %p3473_p12 }
 0xb0b   : > { %p3471_p7 = pneg %p3470_p11 }
 0xb0c   : > { %p3477_p0 = por %p3476_p4, %p3475_p2 }
 0xb0e   : > { %p3478_p8 = pnand %p3477_p0, %p3471_p7 }
 0xb10   : > { %3481 = shalt.err (!%p3478_p8)
}
 0xb11   : > { %s3551_s26 = smov 128  }
 0xb12   : > { %3192 = dma.vmem_to_hbm [thread:$0]  (%p3801_p5), %s4196_s13, 256, %s4193_s18, %s2682_s0, %s3551_s26, %s3551_s26, %s3547_s12  }
 0xb13 PF: > { %s4323_s23 = sld [smem:[#allocation17_spill]]  ;;  %s4324_s21 = sld [smem:[#allocation19_spill]] }
 0xb14   : > { %p4326_p10 = scmp.ge.s32.totalorder %s3532_s30, 2 }
 0xb19   : > { %s2710_s27 = sand.u32 1, %s4323_s23   ;;  %p4325_p6 = scmp.ne.s32.totalorder %s4324_s21, 0 }
 0xb1a   : > { %s2711_s8 = scalar_lea.sflag [#allocation4], %s2710_s27 }
 0xb1b   : > { %p3212_p3 = pnand %p4326_p10, %p4325_p6 }
 0xb1d   : > { %3515 = dma.done.wait (!%p3212_p3), %s2711_s8, 256  }
 0xb1e   : > { %3517 = vsyncadd (!%p3212_p3), %s2711_s8, 4294967040  ;;  %s4327_s16 = sld [smem:[#allocation18_spill]]  ;;  %s4328_s29 = sld [smem:[#allocation20_spill]] }
 0xb1f   : > { %p35_p9 = scmp.ge.s32.totalorder %s3787_s15, 4   ;;  %s4329_s27 = smov %s3524_s28 }
 0xb20   : > { %s4331_s30 = smov %s3787_s15 }
 0xb21   :  { %37 = sbr.rel (!%p35_p9) target bundleno = 22 (0x16), region = 168 }
 0xb24   : > { %s4330_s28 = smov %s4327_s16 }
 0xb28   :  { %2716 = vsyncpa [#allocation3], 1 }
 0xb29   :  { %2718 = vsyncpa [#allocation3 + $0x1], 1 }
 0xb2a   :  { %2719 = vsyncpa [#allocation6], 1 }
 0xb2b   :  { %2721 = vsyncpa [#allocation6 + $0x1], 1 }
 0xb2c   :  { %2722 = vsyncpa [#allocation9], 1 }
 0xb2d   :  { %2723 = vsyncpa [#allocation4], 1 }
 0xb2e   :  { %2725 = vsyncpa [#allocation4 + $0x1], 1 }

</bundles_post_ra>
